<compile_context>
chip_gen: v7x
topology: tpu7x:2x2x1
jax: 0.10.0
libtpu: 0.0.40
codegen_flags: <defaults>
</compile_context>

<pallas_src>
import math

import jax
import jax.numpy as jnp
from jax.experimental import pallas as pl
from jax.experimental.pallas import tpu as pltpu


def downsample_kernel(w_ref, b_ref, x_ref, o_ref):
    """Stride-2 3x3 conv on a parity-split, zero-padded input (one batch elem).

    w_ref: SMEM (Cout*Cin*9,) f32  -- OIHW-flattened conv weights
    b_ref: SMEM (Cout,)       f32  -- bias
    x_ref: VMEM (1, Cin, 2, 2, Ho+1, Wo+1) parity-split zero-padded input
    o_ref: VMEM (1, Cout, Ho, Wo)
    """
    _, cin, _, _, hp, wp = x_ref.shape
    cout = o_ref.shape[1]
    ho, wo = hp - 1, wp - 1

    # Per-output-channel f32 accumulators on lane-dense (Ho, Wo) planes.
    accs = [jnp.zeros((ho, wo), jnp.float32) for _ in range(cout)]

    for ci in range(cin):
        # The 9 taps for this input channel: contiguous static Ref windows,
        # reused across all output channels.
        taps = []
        for dh in range(3):
            ph, rh = dh % 2, dh // 2
            for dw in range(3):
                pw, cw = dw % 2, dw // 2
                taps.append(x_ref[0, ci, ph, pw, rh:rh + ho, cw:cw + wo])
        for co in range(cout):
            base = (co * cin + ci) * 9
            acc = accs[co]
            for t in range(9):
                # SMEM scalar * (Ho, Wo) plane -> broadcast FMA on the VPU.
                acc = acc + w_ref[base + t] * taps[t]
            accs[co] = acc

    for co in range(cout):
        o_ref[0, co] = (accs[co] + b_ref[co]).astype(o_ref.dtype)


def downsample_forward(x_nchw, weight_oihw, bias):
    """Equivalent of torch Downsample.forward:
       pad bottom/right by 1 (zeros), then Conv2d(C, C, k=3, stride=2, p=0).

    x_nchw: (N, C, H, W) f32, weight_oihw: (C, C, 3, 3), bias: (C,)
    returns: (N, C, H//2, W//2) f32
    """
    n, c, h, w = x_nchw.shape
    if (h % 2) or (w % 2):
        # TODO(synk): support odd spatial dims (requires an extra parity case).
        raise ValueError("downsample_forward requires even H and W")
    ho, wo = h // 2, w // 2

    x = x_nchw.astype(jnp.float32)
    # Space-to-depth parity view + the module's bottom/right zero padding,
    # all in one (fusable) XLA pass over the input:
    #   xp[n, c, ph, pw, i, j] = x[n, c, 2i+ph, 2j+pw];  row Ho / col Wo are 0.
    xp = x.reshape(n, c, ho, 2, wo, 2).transpose(0, 1, 3, 5, 2, 4)
    xp = jnp.pad(xp, ((0, 0), (0, 0), (0, 0), (0, 0), (0, 1), (0, 1)))

    w_flat = weight_oihw.astype(jnp.float32).reshape(-1)   # (Cout*Cin*9,) OIHW
    b_flat = bias.astype(jnp.float32).reshape(-1)           # (Cout,)

    return pl.pallas_call(
        downsample_kernel,
        out_shape=jax.ShapeDtypeStruct((n, c, ho, wo), jnp.float32),
        grid=(n,),
        in_specs=[
            pl.BlockSpec(memory_space=pltpu.MemorySpace.SMEM),   # weights
            pl.BlockSpec(memory_space=pltpu.MemorySpace.SMEM),   # bias
            pl.BlockSpec((1, c, 2, 2, ho + 1, wo + 1),
                         lambda b: (b, 0, 0, 0, 0, 0)),          # one image
        ],
        out_specs=pl.BlockSpec((1, c, ho, wo), lambda b: (b, 0, 0, 0)),
        compiler_params=pltpu.CompilerParams(
            dimension_semantics=("parallel",)),
    )(w_flat, b_flat, xp)


if __name__ == "__main__":
    key = jax.random.PRNGKey(0)
    kx, kw, kb = jax.random.split(key, 3)
    N, C, H, W = 2, 4, 16, 16

    x = jax.random.normal(kx, (N, C, H, W), dtype=jnp.float32)
    # Deterministic Conv2d-style init (kaiming_uniform-ish bounds).
    fan_in = C * 3 * 3
    bound = 1.0 / math.sqrt(fan_in)
    weight = jax.random.uniform(kw, (C, C, 3, 3), jnp.float32, -bound, bound)
    bias = jax.random.uniform(kb, (C,), jnp.float32, -bound, bound)

    y = jax.block_until_ready(jax.jit(downsample_forward)(x, weight, bias))
    assert y.shape == (N, C, H // 2, W // 2), y.shape

    # Pure-JAX reference: asymmetric zero pad folded into the conv's padding.
    ref = jax.lax.conv_general_dilated(
        x, weight, window_strides=(2, 2), padding=((0, 1), (0, 1)),
        dimension_numbers=("NCHW", "OIHW", "NCHW"),
        precision=jax.lax.Precision.HIGHEST) + bias[None, :, None, None]
    assert jnp.allclose(y, ref, atol=1e-4, rtol=1e-4), float(jnp.abs(y - ref).max())

    print("KERNEL_OK")
</pallas_src>

<mosaic_0001>
module attributes {stable_mosaic.version = 11 : i64} {
  func.func @downsample_kernel(%arg0: i32, %arg1: memref<144xf32, #tpu.memory_space<smem>>, %arg2: memref<4xf32, #tpu.memory_space<smem>>, %arg3: memref<1x4x2x2x9x9xf32, #tpu.memory_space<vmem>>, %arg4: memref<1x4x8x8xf32, #tpu.memory_space<vmem>>) attributes {dimension_semantics = [#tpu.dimension_semantics<parallel>], iteration_bounds = array<i64: 2>, scalar_prefetch = 0 : i64, scratch_operands = 0 : i64, tpu.core_type = #tpu.core_type<tc>, window_params = [{transform_indices = @transform_0, window_bounds = array<i64: 144>}, {transform_indices = @transform_1, window_bounds = array<i64: 4>}, {transform_indices = @transform_2, window_bounds = array<i64: 1, 4, 2, 2, 9, 9>}, {transform_indices = @transform_3, window_bounds = array<i64: 1, 4, 8, 8>}]} {
    %cst = arith.constant 0.000000e+00 : f32
    %0 = vector.broadcast %cst : f32 to vector<8x8xf32>
    %cst_0 = arith.constant 0.000000e+00 : f32
    %1 = vector.broadcast %cst_0 : f32 to vector<8x8xf32>
    %cst_1 = arith.constant 0.000000e+00 : f32
    %2 = vector.broadcast %cst_1 : f32 to vector<8x8xf32>
    %cst_2 = arith.constant 0.000000e+00 : f32
    %3 = vector.broadcast %cst_2 : f32 to vector<8x8xf32>
    %c0 = arith.constant 0 : index
    %c0_3 = arith.constant 0 : index
    %c0_4 = arith.constant 0 : index
    %c0_5 = arith.constant 0 : index
    %c0_6 = arith.constant 0 : index
    %c0_7 = arith.constant 0 : index
    %4 = vector.load %arg3[%c0, %c0_3, %c0_4, %c0_5, %c0_6, %c0_7] : memref<1x4x2x2x9x9xf32, #tpu.memory_space<vmem>>, vector<1x1x1x1x8x8xf32>
    %5 = vector.shape_cast %4 : vector<1x1x1x1x8x8xf32> to vector<8x8xf32>
    %c0_8 = arith.constant 0 : index
    %c0_9 = arith.constant 0 : index
    %c0_10 = arith.constant 0 : index
    %c1 = arith.constant 1 : index
    %c0_11 = arith.constant 0 : index
    %c0_12 = arith.constant 0 : index
    %6 = vector.load %arg3[%c0_8, %c0_9, %c0_10, %c1, %c0_11, %c0_12] : memref<1x4x2x2x9x9xf32, #tpu.memory_space<vmem>>, vector<1x1x1x1x8x8xf32>
    %7 = vector.shape_cast %6 : vector<1x1x1x1x8x8xf32> to vector<8x8xf32>
    %c0_13 = arith.constant 0 : index
    %c0_14 = arith.constant 0 : index
    %c0_15 = arith.constant 0 : index
    %c0_16 = arith.constant 0 : index
    %c0_17 = arith.constant 0 : index
    %c1_18 = arith.constant 1 : index
    %8 = vector.load %arg3[%c0_13, %c0_14, %c0_15, %c0_16, %c0_17, %c1_18] : memref<1x4x2x2x9x9xf32, #tpu.memory_space<vmem>>, vector<1x1x1x1x8x8xf32>
    %9 = vector.shape_cast %8 : vector<1x1x1x1x8x8xf32> to vector<8x8xf32>
    %c0_19 = arith.constant 0 : index
    %c0_20 = arith.constant 0 : index
    %c1_21 = arith.constant 1 : index
    %c0_22 = arith.constant 0 : index
    %c0_23 = arith.constant 0 : index
    %c0_24 = arith.constant 0 : index
    %10 = vector.load %arg3[%c0_19, %c0_20, %c1_21, %c0_22, %c0_23, %c0_24] : memref<1x4x2x2x9x9xf32, #tpu.memory_space<vmem>>, vector<1x1x1x1x8x8xf32>
    %11 = vector.shape_cast %10 : vector<1x1x1x1x8x8xf32> to vector<8x8xf32>
    %c0_25 = arith.constant 0 : index
    %c0_26 = arith.constant 0 : index
    %c1_27 = arith.constant 1 : index
    %c1_28 = arith.constant 1 : index
    %c0_29 = arith.constant 0 : index
    %c0_30 = arith.constant 0 : index
    %12 = vector.load %arg3[%c0_25, %c0_26, %c1_27, %c1_28, %c0_29, %c0_30] : memref<1x4x2x2x9x9xf32, #tpu.memory_space<vmem>>, vector<1x1x1x1x8x8xf32>
    %13 = vector.shape_cast %12 : vector<1x1x1x1x8x8xf32> to vector<8x8xf32>
    %c0_31 = arith.constant 0 : index
    %c0_32 = arith.constant 0 : index
    %c1_33 = arith.constant 1 : index
    %c0_34 = arith.constant 0 : index
    %c0_35 = arith.constant 0 : index
    %c1_36 = arith.constant 1 : index
    %14 = vector.load %arg3[%c0_31, %c0_32, %c1_33, %c0_34, %c0_35, %c1_36] : memref<1x4x2x2x9x9xf32, #tpu.memory_space<vmem>>, vector<1x1x1x1x8x8xf32>
    %15 = vector.shape_cast %14 : vector<1x1x1x1x8x8xf32> to vector<8x8xf32>
    %c0_37 = arith.constant 0 : index
    %c0_38 = arith.constant 0 : index
    %c0_39 = arith.constant 0 : index
    %c0_40 = arith.constant 0 : index
    %c1_41 = arith.constant 1 : index
    %c0_42 = arith.constant 0 : index
    %16 = vector.load %arg3[%c0_37, %c0_38, %c0_39, %c0_40, %c1_41, %c0_42] : memref<1x4x2x2x9x9xf32, #tpu.memory_space<vmem>>, vector<1x1x1x1x8x8xf32>
    %17 = vector.shape_cast %16 : vector<1x1x1x1x8x8xf32> to vector<8x8xf32>
    %c0_43 = arith.constant 0 : index
    %c0_44 = arith.constant 0 : index
    %c0_45 = arith.constant 0 : index
    %c1_46 = arith.constant 1 : index
    %c1_47 = arith.constant 1 : index
    %c0_48 = arith.constant 0 : index
    %18 = vector.load %arg3[%c0_43, %c0_44, %c0_45, %c1_46, %c1_47, %c0_48] : memref<1x4x2x2x9x9xf32, #tpu.memory_space<vmem>>, vector<1x1x1x1x8x8xf32>
    %19 = vector.shape_cast %18 : vector<1x1x1x1x8x8xf32> to vector<8x8xf32>
    %c0_49 = arith.constant 0 : index
    %c0_50 = arith.constant 0 : index
    %c0_51 = arith.constant 0 : index
    %c0_52 = arith.constant 0 : index
    %c1_53 = arith.constant 1 : index
    %c1_54 = arith.constant 1 : index
    %20 = vector.load %arg3[%c0_49, %c0_50, %c0_51, %c0_52, %c1_53, %c1_54] : memref<1x4x2x2x9x9xf32, #tpu.memory_space<vmem>>, vector<1x1x1x1x8x8xf32>
    %21 = vector.shape_cast %20 : vector<1x1x1x1x8x8xf32> to vector<8x8xf32>
    %c0_55 = arith.constant 0 : index
    %22 = memref.load %arg1[%c0_55] : memref<144xf32, #tpu.memory_space<smem>>
    %23 = vector.broadcast %22 : f32 to vector<8x8xf32>
    %24 = arith.mulf %23, %5 : vector<8x8xf32>
    %25 = arith.addf %0, %24 : vector<8x8xf32>
    %c1_56 = arith.constant 1 : index
    %26 = memref.load %arg1[%c1_56] : memref<144xf32, #tpu.memory_space<smem>>
    %27 = vector.broadcast %26 : f32 to vector<8x8xf32>
    %28 = arith.mulf %27, %7 : vector<8x8xf32>
    %29 = arith.addf %25, %28 : vector<8x8xf32>
    %c2 = arith.constant 2 : index
    %30 = memref.load %arg1[%c2] : memref<144xf32, #tpu.memory_space<smem>>
    %31 = vector.broadcast %30 : f32 to vector<8x8xf32>
    %32 = arith.mulf %31, %9 : vector<8x8xf32>
    %33 = arith.addf %29, %32 : vector<8x8xf32>
    %c3 = arith.constant 3 : index
    %34 = memref.load %arg1[%c3] : memref<144xf32, #tpu.memory_space<smem>>
    %35 = vector.broadcast %34 : f32 to vector<8x8xf32>
    %36 = arith.mulf %35, %11 : vector<8x8xf32>
    %37 = arith.addf %33, %36 : vector<8x8xf32>
    %c4 = arith.constant 4 : index
    %38 = memref.load %arg1[%c4] : memref<144xf32, #tpu.memory_space<smem>>
    %39 = vector.broadcast %38 : f32 to vector<8x8xf32>
    %40 = arith.mulf %39, %13 : vector<8x8xf32>
    %41 = arith.addf %37, %40 : vector<8x8xf32>
    %c5 = arith.constant 5 : index
    %42 = memref.load %arg1[%c5] : memref<144xf32, #tpu.memory_space<smem>>
    %43 = vector.broadcast %42 : f32 to vector<8x8xf32>
    %44 = arith.mulf %43, %15 : vector<8x8xf32>
    %45 = arith.addf %41, %44 : vector<8x8xf32>
    %c6 = arith.constant 6 : index
    %46 = memref.load %arg1[%c6] : memref<144xf32, #tpu.memory_space<smem>>
    %47 = vector.broadcast %46 : f32 to vector<8x8xf32>
    %48 = arith.mulf %47, %17 : vector<8x8xf32>
    %49 = arith.addf %45, %48 : vector<8x8xf32>
    %c7 = arith.constant 7 : index
    %50 = memref.load %arg1[%c7] : memref<144xf32, #tpu.memory_space<smem>>
    %51 = vector.broadcast %50 : f32 to vector<8x8xf32>
    %52 = arith.mulf %51, %19 : vector<8x8xf32>
    %53 = arith.addf %49, %52 : vector<8x8xf32>
    %c8 = arith.constant 8 : index
    %54 = memref.load %arg1[%c8] : memref<144xf32, #tpu.memory_space<smem>>
    %55 = vector.broadcast %54 : f32 to vector<8x8xf32>
    %56 = arith.mulf %55, %21 : vector<8x8xf32>
    %57 = arith.addf %53, %56 : vector<8x8xf32>
    %c36 = arith.constant 36 : index
    %58 = memref.load %arg1[%c36] : memref<144xf32, #tpu.memory_space<smem>>
    %59 = vector.broadcast %58 : f32 to vector<8x8xf32>
    %60 = arith.mulf %59, %5 : vector<8x8xf32>
    %61 = arith.addf %1, %60 : vector<8x8xf32>
    %c37 = arith.constant 37 : index
    %62 = memref.load %arg1[%c37] : memref<144xf32, #tpu.memory_space<smem>>
    %63 = vector.broadcast %62 : f32 to vector<8x8xf32>
    %64 = arith.mulf %63, %7 : vector<8x8xf32>
    %65 = arith.addf %61, %64 : vector<8x8xf32>
    %c38 = arith.constant 38 : index
    %66 = memref.load %arg1[%c38] : memref<144xf32, #tpu.memory_space<smem>>
    %67 = vector.broadcast %66 : f32 to vector<8x8xf32>
    %68 = arith.mulf %67, %9 : vector<8x8xf32>
    %69 = arith.addf %65, %68 : vector<8x8xf32>
    %c39 = arith.constant 39 : index
    %70 = memref.load %arg1[%c39] : memref<144xf32, #tpu.memory_space<smem>>
    %71 = vector.broadcast %70 : f32 to vector<8x8xf32>
    %72 = arith.mulf %71, %11 : vector<8x8xf32>
    %73 = arith.addf %69, %72 : vector<8x8xf32>
    %c40 = arith.constant 40 : index
    %74 = memref.load %arg1[%c40] : memref<144xf32, #tpu.memory_space<smem>>
    %75 = vector.broadcast %74 : f32 to vector<8x8xf32>
    %76 = arith.mulf %75, %13 : vector<8x8xf32>
    %77 = arith.addf %73, %76 : vector<8x8xf32>
    %c41 = arith.constant 41 : index
    %78 = memref.load %arg1[%c41] : memref<144xf32, #tpu.memory_space<smem>>
    %79 = vector.broadcast %78 : f32 to vector<8x8xf32>
    %80 = arith.mulf %79, %15 : vector<8x8xf32>
    %81 = arith.addf %77, %80 : vector<8x8xf32>
    %c42 = arith.constant 42 : index
    %82 = memref.load %arg1[%c42] : memref<144xf32, #tpu.memory_space<smem>>
    %83 = vector.broadcast %82 : f32 to vector<8x8xf32>
    %84 = arith.mulf %83, %17 : vector<8x8xf32>
    %85 = arith.addf %81, %84 : vector<8x8xf32>
    %c43 = arith.constant 43 : index
    %86 = memref.load %arg1[%c43] : memref<144xf32, #tpu.memory_space<smem>>
    %87 = vector.broadcast %86 : f32 to vector<8x8xf32>
    %88 = arith.mulf %87, %19 : vector<8x8xf32>
    %89 = arith.addf %85, %88 : vector<8x8xf32>
    %c44 = arith.constant 44 : index
    %90 = memref.load %arg1[%c44] : memref<144xf32, #tpu.memory_space<smem>>
    %91 = vector.broadcast %90 : f32 to vector<8x8xf32>
    %92 = arith.mulf %91, %21 : vector<8x8xf32>
    %93 = arith.addf %89, %92 : vector<8x8xf32>
    %c72 = arith.constant 72 : index
    %94 = memref.load %arg1[%c72] : memref<144xf32, #tpu.memory_space<smem>>
    %95 = vector.broadcast %94 : f32 to vector<8x8xf32>
    %96 = arith.mulf %95, %5 : vector<8x8xf32>
    %97 = arith.addf %2, %96 : vector<8x8xf32>
    %c73 = arith.constant 73 : index
    %98 = memref.load %arg1[%c73] : memref<144xf32, #tpu.memory_space<smem>>
    %99 = vector.broadcast %98 : f32 to vector<8x8xf32>
    %100 = arith.mulf %99, %7 : vector<8x8xf32>
    %101 = arith.addf %97, %100 : vector<8x8xf32>
    %c74 = arith.constant 74 : index
    %102 = memref.load %arg1[%c74] : memref<144xf32, #tpu.memory_space<smem>>
    %103 = vector.broadcast %102 : f32 to vector<8x8xf32>
    %104 = arith.mulf %103, %9 : vector<8x8xf32>
    %105 = arith.addf %101, %104 : vector<8x8xf32>
    %c75 = arith.constant 75 : index
    %106 = memref.load %arg1[%c75] : memref<144xf32, #tpu.memory_space<smem>>
    %107 = vector.broadcast %106 : f32 to vector<8x8xf32>
    %108 = arith.mulf %107, %11 : vector<8x8xf32>
    %109 = arith.addf %105, %108 : vector<8x8xf32>
    %c76 = arith.constant 76 : index
    %110 = memref.load %arg1[%c76] : memref<144xf32, #tpu.memory_space<smem>>
    %111 = vector.broadcast %110 : f32 to vector<8x8xf32>
    %112 = arith.mulf %111, %13 : vector<8x8xf32>
    %113 = arith.addf %109, %112 : vector<8x8xf32>
    %c77 = arith.constant 77 : index
    %114 = memref.load %arg1[%c77] : memref<144xf32, #tpu.memory_space<smem>>
    %115 = vector.broadcast %114 : f32 to vector<8x8xf32>
    %116 = arith.mulf %115, %15 : vector<8x8xf32>
    %117 = arith.addf %113, %116 : vector<8x8xf32>
    %c78 = arith.constant 78 : index
    %118 = memref.load %arg1[%c78] : memref<144xf32, #tpu.memory_space<smem>>
    %119 = vector.broadcast %118 : f32 to vector<8x8xf32>
    %120 = arith.mulf %119, %17 : vector<8x8xf32>
    %121 = arith.addf %117, %120 : vector<8x8xf32>
    %c79 = arith.constant 79 : index
    %122 = memref.load %arg1[%c79] : memref<144xf32, #tpu.memory_space<smem>>
    %123 = vector.broadcast %122 : f32 to vector<8x8xf32>
    %124 = arith.mulf %123, %19 : vector<8x8xf32>
    %125 = arith.addf %121, %124 : vector<8x8xf32>
    %c80 = arith.constant 80 : index
    %126 = memref.load %arg1[%c80] : memref<144xf32, #tpu.memory_space<smem>>
    %127 = vector.broadcast %126 : f32 to vector<8x8xf32>
    %128 = arith.mulf %127, %21 : vector<8x8xf32>
    %129 = arith.addf %125, %128 : vector<8x8xf32>
    %c108 = arith.constant 108 : index
    %130 = memref.load %arg1[%c108] : memref<144xf32, #tpu.memory_space<smem>>
    %131 = vector.broadcast %130 : f32 to vector<8x8xf32>
    %132 = arith.mulf %131, %5 : vector<8x8xf32>
    %133 = arith.addf %3, %132 : vector<8x8xf32>
    %c109 = arith.constant 109 : index
    %134 = memref.load %arg1[%c109] : memref<144xf32, #tpu.memory_space<smem>>
    %135 = vector.broadcast %134 : f32 to vector<8x8xf32>
    %136 = arith.mulf %135, %7 : vector<8x8xf32>
    %137 = arith.addf %133, %136 : vector<8x8xf32>
    %c110 = arith.constant 110 : index
    %138 = memref.load %arg1[%c110] : memref<144xf32, #tpu.memory_space<smem>>
    %139 = vector.broadcast %138 : f32 to vector<8x8xf32>
    %140 = arith.mulf %139, %9 : vector<8x8xf32>
    %141 = arith.addf %137, %140 : vector<8x8xf32>
    %c111 = arith.constant 111 : index
    %142 = memref.load %arg1[%c111] : memref<144xf32, #tpu.memory_space<smem>>
    %143 = vector.broadcast %142 : f32 to vector<8x8xf32>
    %144 = arith.mulf %143, %11 : vector<8x8xf32>
    %145 = arith.addf %141, %144 : vector<8x8xf32>
    %c112 = arith.constant 112 : index
    %146 = memref.load %arg1[%c112] : memref<144xf32, #tpu.memory_space<smem>>
    %147 = vector.broadcast %146 : f32 to vector<8x8xf32>
    %148 = arith.mulf %147, %13 : vector<8x8xf32>
    %149 = arith.addf %145, %148 : vector<8x8xf32>
    %c113 = arith.constant 113 : index
    %150 = memref.load %arg1[%c113] : memref<144xf32, #tpu.memory_space<smem>>
    %151 = vector.broadcast %150 : f32 to vector<8x8xf32>
    %152 = arith.mulf %151, %15 : vector<8x8xf32>
    %153 = arith.addf %149, %152 : vector<8x8xf32>
    %c114 = arith.constant 114 : index
    %154 = memref.load %arg1[%c114] : memref<144xf32, #tpu.memory_space<smem>>
    %155 = vector.broadcast %154 : f32 to vector<8x8xf32>
    %156 = arith.mulf %155, %17 : vector<8x8xf32>
    %157 = arith.addf %153, %156 : vector<8x8xf32>
    %c115 = arith.constant 115 : index
    %158 = memref.load %arg1[%c115] : memref<144xf32, #tpu.memory_space<smem>>
    %159 = vector.broadcast %158 : f32 to vector<8x8xf32>
    %160 = arith.mulf %159, %19 : vector<8x8xf32>
    %161 = arith.addf %157, %160 : vector<8x8xf32>
    %c116 = arith.constant 116 : index
    %162 = memref.load %arg1[%c116] : memref<144xf32, #tpu.memory_space<smem>>
    %163 = vector.broadcast %162 : f32 to vector<8x8xf32>
    %164 = arith.mulf %163, %21 : vector<8x8xf32>
    %165 = arith.addf %161, %164 : vector<8x8xf32>
    %c0_57 = arith.constant 0 : index
    %c1_58 = arith.constant 1 : index
    %c0_59 = arith.constant 0 : index
    %c0_60 = arith.constant 0 : index
    %c0_61 = arith.constant 0 : index
    %c0_62 = arith.constant 0 : index
    %166 = vector.load %arg3[%c0_57, %c1_58, %c0_59, %c0_60, %c0_61, %c0_62] : memref<1x4x2x2x9x9xf32, #tpu.memory_space<vmem>>, vector<1x1x1x1x8x8xf32>
    %167 = vector.shape_cast %166 : vector<1x1x1x1x8x8xf32> to vector<8x8xf32>
    %c0_63 = arith.constant 0 : index
    %c1_64 = arith.constant 1 : index
    %c0_65 = arith.constant 0 : index
    %c1_66 = arith.constant 1 : index
    %c0_67 = arith.constant 0 : index
    %c0_68 = arith.constant 0 : index
    %168 = vector.load %arg3[%c0_63, %c1_64, %c0_65, %c1_66, %c0_67, %c0_68] : memref<1x4x2x2x9x9xf32, #tpu.memory_space<vmem>>, vector<1x1x1x1x8x8xf32>
    %169 = vector.shape_cast %168 : vector<1x1x1x1x8x8xf32> to vector<8x8xf32>
    %c0_69 = arith.constant 0 : index
    %c1_70 = arith.constant 1 : index
    %c0_71 = arith.constant 0 : index
    %c0_72 = arith.constant 0 : index
    %c0_73 = arith.constant 0 : index
    %c1_74 = arith.constant 1 : index
    %170 = vector.load %arg3[%c0_69, %c1_70, %c0_71, %c0_72, %c0_73, %c1_74] : memref<1x4x2x2x9x9xf32, #tpu.memory_space<vmem>>, vector<1x1x1x1x8x8xf32>
    %171 = vector.shape_cast %170 : vector<1x1x1x1x8x8xf32> to vector<8x8xf32>
    %c0_75 = arith.constant 0 : index
    %c1_76 = arith.constant 1 : index
    %c1_77 = arith.constant 1 : index
    %c0_78 = arith.constant 0 : index
    %c0_79 = arith.constant 0 : index
    %c0_80 = arith.constant 0 : index
    %172 = vector.load %arg3[%c0_75, %c1_76, %c1_77, %c0_78, %c0_79, %c0_80] : memref<1x4x2x2x9x9xf32, #tpu.memory_space<vmem>>, vector<1x1x1x1x8x8xf32>
    %173 = vector.shape_cast %172 : vector<1x1x1x1x8x8xf32> to vector<8x8xf32>
    %c0_81 = arith.constant 0 : index
    %c1_82 = arith.constant 1 : index
    %c1_83 = arith.constant 1 : index
    %c1_84 = arith.constant 1 : index
    %c0_85 = arith.constant 0 : index
    %c0_86 = arith.constant 0 : index
    %174 = vector.load %arg3[%c0_81, %c1_82, %c1_83, %c1_84, %c0_85, %c0_86] : memref<1x4x2x2x9x9xf32, #tpu.memory_space<vmem>>, vector<1x1x1x1x8x8xf32>
    %175 = vector.shape_cast %174 : vector<1x1x1x1x8x8xf32> to vector<8x8xf32>
    %c0_87 = arith.constant 0 : index
    %c1_88 = arith.constant 1 : index
    %c1_89 = arith.constant 1 : index
    %c0_90 = arith.constant 0 : index
    %c0_91 = arith.constant 0 : index
    %c1_92 = arith.constant 1 : index
    %176 = vector.load %arg3[%c0_87, %c1_88, %c1_89, %c0_90, %c0_91, %c1_92] : memref<1x4x2x2x9x9xf32, #tpu.memory_space<vmem>>, vector<1x1x1x1x8x8xf32>
    %177 = vector.shape_cast %176 : vector<1x1x1x1x8x8xf32> to vector<8x8xf32>
    %c0_93 = arith.constant 0 : index
    %c1_94 = arith.constant 1 : index
    %c0_95 = arith.constant 0 : index
    %c0_96 = arith.constant 0 : index
    %c1_97 = arith.constant 1 : index
    %c0_98 = arith.constant 0 : index
    %178 = vector.load %arg3[%c0_93, %c1_94, %c0_95, %c0_96, %c1_97, %c0_98] : memref<1x4x2x2x9x9xf32, #tpu.memory_space<vmem>>, vector<1x1x1x1x8x8xf32>
    %179 = vector.shape_cast %178 : vector<1x1x1x1x8x8xf32> to vector<8x8xf32>
    %c0_99 = arith.constant 0 : index
    %c1_100 = arith.constant 1 : index
    %c0_101 = arith.constant 0 : index
    %c1_102 = arith.constant 1 : index
    %c1_103 = arith.constant 1 : index
    %c0_104 = arith.constant 0 : index
    %180 = vector.load %arg3[%c0_99, %c1_100, %c0_101, %c1_102, %c1_103, %c0_104] : memref<1x4x2x2x9x9xf32, #tpu.memory_space<vmem>>, vector<1x1x1x1x8x8xf32>
    %181 = vector.shape_cast %180 : vector<1x1x1x1x8x8xf32> to vector<8x8xf32>
    %c0_105 = arith.constant 0 : index
    %c1_106 = arith.constant 1 : index
    %c0_107 = arith.constant 0 : index
    %c0_108 = arith.constant 0 : index
    %c1_109 = arith.constant 1 : index
    %c1_110 = arith.constant 1 : index
    %182 = vector.load %arg3[%c0_105, %c1_106, %c0_107, %c0_108, %c1_109, %c1_110] : memref<1x4x2x2x9x9xf32, #tpu.memory_space<vmem>>, vector<1x1x1x1x8x8xf32>
    %183 = vector.shape_cast %182 : vector<1x1x1x1x8x8xf32> to vector<8x8xf32>
    %c9 = arith.constant 9 : index
    %184 = memref.load %arg1[%c9] : memref<144xf32, #tpu.memory_space<smem>>
    %185 = vector.broadcast %184 : f32 to vector<8x8xf32>
    %186 = arith.mulf %185, %167 : vector<8x8xf32>
    %187 = arith.addf %57, %186 : vector<8x8xf32>
    %c10 = arith.constant 10 : index
    %188 = memref.load %arg1[%c10] : memref<144xf32, #tpu.memory_space<smem>>
    %189 = vector.broadcast %188 : f32 to vector<8x8xf32>
    %190 = arith.mulf %189, %169 : vector<8x8xf32>
    %191 = arith.addf %187, %190 : vector<8x8xf32>
    %c11 = arith.constant 11 : index
    %192 = memref.load %arg1[%c11] : memref<144xf32, #tpu.memory_space<smem>>
    %193 = vector.broadcast %192 : f32 to vector<8x8xf32>
    %194 = arith.mulf %193, %171 : vector<8x8xf32>
    %195 = arith.addf %191, %194 : vector<8x8xf32>
    %c12 = arith.constant 12 : index
    %196 = memref.load %arg1[%c12] : memref<144xf32, #tpu.memory_space<smem>>
    %197 = vector.broadcast %196 : f32 to vector<8x8xf32>
    %198 = arith.mulf %197, %173 : vector<8x8xf32>
    %199 = arith.addf %195, %198 : vector<8x8xf32>
    %c13 = arith.constant 13 : index
    %200 = memref.load %arg1[%c13] : memref<144xf32, #tpu.memory_space<smem>>
    %201 = vector.broadcast %200 : f32 to vector<8x8xf32>
    %202 = arith.mulf %201, %175 : vector<8x8xf32>
    %203 = arith.addf %199, %202 : vector<8x8xf32>
    %c14 = arith.constant 14 : index
    %204 = memref.load %arg1[%c14] : memref<144xf32, #tpu.memory_space<smem>>
    %205 = vector.broadcast %204 : f32 to vector<8x8xf32>
    %206 = arith.mulf %205, %177 : vector<8x8xf32>
    %207 = arith.addf %203, %206 : vector<8x8xf32>
    %c15 = arith.constant 15 : index
    %208 = memref.load %arg1[%c15] : memref<144xf32, #tpu.memory_space<smem>>
    %209 = vector.broadcast %208 : f32 to vector<8x8xf32>
    %210 = arith.mulf %209, %179 : vector<8x8xf32>
    %211 = arith.addf %207, %210 : vector<8x8xf32>
    %c16 = arith.constant 16 : index
    %212 = memref.load %arg1[%c16] : memref<144xf32, #tpu.memory_space<smem>>
    %213 = vector.broadcast %212 : f32 to vector<8x8xf32>
    %214 = arith.mulf %213, %181 : vector<8x8xf32>
    %215 = arith.addf %211, %214 : vector<8x8xf32>
    %c17 = arith.constant 17 : index
    %216 = memref.load %arg1[%c17] : memref<144xf32, #tpu.memory_space<smem>>
    %217 = vector.broadcast %216 : f32 to vector<8x8xf32>
    %218 = arith.mulf %217, %183 : vector<8x8xf32>
    %219 = arith.addf %215, %218 : vector<8x8xf32>
    %c45 = arith.constant 45 : index
    %220 = memref.load %arg1[%c45] : memref<144xf32, #tpu.memory_space<smem>>
    %221 = vector.broadcast %220 : f32 to vector<8x8xf32>
    %222 = arith.mulf %221, %167 : vector<8x8xf32>
    %223 = arith.addf %93, %222 : vector<8x8xf32>
    %c46 = arith.constant 46 : index
    %224 = memref.load %arg1[%c46] : memref<144xf32, #tpu.memory_space<smem>>
    %225 = vector.broadcast %224 : f32 to vector<8x8xf32>
    %226 = arith.mulf %225, %169 : vector<8x8xf32>
    %227 = arith.addf %223, %226 : vector<8x8xf32>
    %c47 = arith.constant 47 : index
    %228 = memref.load %arg1[%c47] : memref<144xf32, #tpu.memory_space<smem>>
    %229 = vector.broadcast %228 : f32 to vector<8x8xf32>
    %230 = arith.mulf %229, %171 : vector<8x8xf32>
    %231 = arith.addf %227, %230 : vector<8x8xf32>
    %c48 = arith.constant 48 : index
    %232 = memref.load %arg1[%c48] : memref<144xf32, #tpu.memory_space<smem>>
    %233 = vector.broadcast %232 : f32 to vector<8x8xf32>
    %234 = arith.mulf %233, %173 : vector<8x8xf32>
    %235 = arith.addf %231, %234 : vector<8x8xf32>
    %c49 = arith.constant 49 : index
    %236 = memref.load %arg1[%c49] : memref<144xf32, #tpu.memory_space<smem>>
    %237 = vector.broadcast %236 : f32 to vector<8x8xf32>
    %238 = arith.mulf %237, %175 : vector<8x8xf32>
    %239 = arith.addf %235, %238 : vector<8x8xf32>
    %c50 = arith.constant 50 : index
    %240 = memref.load %arg1[%c50] : memref<144xf32, #tpu.memory_space<smem>>
    %241 = vector.broadcast %240 : f32 to vector<8x8xf32>
    %242 = arith.mulf %241, %177 : vector<8x8xf32>
    %243 = arith.addf %239, %242 : vector<8x8xf32>
    %c51 = arith.constant 51 : index
    %244 = memref.load %arg1[%c51] : memref<144xf32, #tpu.memory_space<smem>>
    %245 = vector.broadcast %244 : f32 to vector<8x8xf32>
    %246 = arith.mulf %245, %179 : vector<8x8xf32>
    %247 = arith.addf %243, %246 : vector<8x8xf32>
    %c52 = arith.constant 52 : index
    %248 = memref.load %arg1[%c52] : memref<144xf32, #tpu.memory_space<smem>>
    %249 = vector.broadcast %248 : f32 to vector<8x8xf32>
    %250 = arith.mulf %249, %181 : vector<8x8xf32>
    %251 = arith.addf %247, %250 : vector<8x8xf32>
    %c53 = arith.constant 53 : index
    %252 = memref.load %arg1[%c53] : memref<144xf32, #tpu.memory_space<smem>>
    %253 = vector.broadcast %252 : f32 to vector<8x8xf32>
    %254 = arith.mulf %253, %183 : vector<8x8xf32>
    %255 = arith.addf %251, %254 : vector<8x8xf32>
    %c81 = arith.constant 81 : index
    %256 = memref.load %arg1[%c81] : memref<144xf32, #tpu.memory_space<smem>>
    %257 = vector.broadcast %256 : f32 to vector<8x8xf32>
    %258 = arith.mulf %257, %167 : vector<8x8xf32>
    %259 = arith.addf %129, %258 : vector<8x8xf32>
    %c82 = arith.constant 82 : index
    %260 = memref.load %arg1[%c82] : memref<144xf32, #tpu.memory_space<smem>>
    %261 = vector.broadcast %260 : f32 to vector<8x8xf32>
    %262 = arith.mulf %261, %169 : vector<8x8xf32>
    %263 = arith.addf %259, %262 : vector<8x8xf32>
    %c83 = arith.constant 83 : index
    %264 = memref.load %arg1[%c83] : memref<144xf32, #tpu.memory_space<smem>>
    %265 = vector.broadcast %264 : f32 to vector<8x8xf32>
    %266 = arith.mulf %265, %171 : vector<8x8xf32>
    %267 = arith.addf %263, %266 : vector<8x8xf32>
    %c84 = arith.constant 84 : index
    %268 = memref.load %arg1[%c84] : memref<144xf32, #tpu.memory_space<smem>>
    %269 = vector.broadcast %268 : f32 to vector<8x8xf32>
    %270 = arith.mulf %269, %173 : vector<8x8xf32>
    %271 = arith.addf %267, %270 : vector<8x8xf32>
    %c85 = arith.constant 85 : index
    %272 = memref.load %arg1[%c85] : memref<144xf32, #tpu.memory_space<smem>>
    %273 = vector.broadcast %272 : f32 to vector<8x8xf32>
    %274 = arith.mulf %273, %175 : vector<8x8xf32>
    %275 = arith.addf %271, %274 : vector<8x8xf32>
    %c86 = arith.constant 86 : index
    %276 = memref.load %arg1[%c86] : memref<144xf32, #tpu.memory_space<smem>>
    %277 = vector.broadcast %276 : f32 to vector<8x8xf32>
    %278 = arith.mulf %277, %177 : vector<8x8xf32>
    %279 = arith.addf %275, %278 : vector<8x8xf32>
    %c87 = arith.constant 87 : index
    %280 = memref.load %arg1[%c87] : memref<144xf32, #tpu.memory_space<smem>>
    %281 = vector.broadcast %280 : f32 to vector<8x8xf32>
    %282 = arith.mulf %281, %179 : vector<8x8xf32>
    %283 = arith.addf %279, %282 : vector<8x8xf32>
    %c88 = arith.constant 88 : index
    %284 = memref.load %arg1[%c88] : memref<144xf32, #tpu.memory_space<smem>>
    %285 = vector.broadcast %284 : f32 to vector<8x8xf32>
    %286 = arith.mulf %285, %181 : vector<8x8xf32>
    %287 = arith.addf %283, %286 : vector<8x8xf32>
    %c89 = arith.constant 89 : index
    %288 = memref.load %arg1[%c89] : memref<144xf32, #tpu.memory_space<smem>>
    %289 = vector.broadcast %288 : f32 to vector<8x8xf32>
    %290 = arith.mulf %289, %183 : vector<8x8xf32>
    %291 = arith.addf %287, %290 : vector<8x8xf32>
    %c117 = arith.constant 117 : index
    %292 = memref.load %arg1[%c117] : memref<144xf32, #tpu.memory_space<smem>>
    %293 = vector.broadcast %292 : f32 to vector<8x8xf32>
    %294 = arith.mulf %293, %167 : vector<8x8xf32>
    %295 = arith.addf %165, %294 : vector<8x8xf32>
    %c118 = arith.constant 118 : index
    %296 = memref.load %arg1[%c118] : memref<144xf32, #tpu.memory_space<smem>>
    %297 = vector.broadcast %296 : f32 to vector<8x8xf32>
    %298 = arith.mulf %297, %169 : vector<8x8xf32>
    %299 = arith.addf %295, %298 : vector<8x8xf32>
    %c119 = arith.constant 119 : index
    %300 = memref.load %arg1[%c119] : memref<144xf32, #tpu.memory_space<smem>>
    %301 = vector.broadcast %300 : f32 to vector<8x8xf32>
    %302 = arith.mulf %301, %171 : vector<8x8xf32>
    %303 = arith.addf %299, %302 : vector<8x8xf32>
    %c120 = arith.constant 120 : index
    %304 = memref.load %arg1[%c120] : memref<144xf32, #tpu.memory_space<smem>>
    %305 = vector.broadcast %304 : f32 to vector<8x8xf32>
    %306 = arith.mulf %305, %173 : vector<8x8xf32>
    %307 = arith.addf %303, %306 : vector<8x8xf32>
    %c121 = arith.constant 121 : index
    %308 = memref.load %arg1[%c121] : memref<144xf32, #tpu.memory_space<smem>>
    %309 = vector.broadcast %308 : f32 to vector<8x8xf32>
    %310 = arith.mulf %309, %175 : vector<8x8xf32>
    %311 = arith.addf %307, %310 : vector<8x8xf32>
    %c122 = arith.constant 122 : index
    %312 = memref.load %arg1[%c122] : memref<144xf32, #tpu.memory_space<smem>>
    %313 = vector.broadcast %312 : f32 to vector<8x8xf32>
    %314 = arith.mulf %313, %177 : vector<8x8xf32>
    %315 = arith.addf %311, %314 : vector<8x8xf32>
    %c123 = arith.constant 123 : index
    %316 = memref.load %arg1[%c123] : memref<144xf32, #tpu.memory_space<smem>>
    %317 = vector.broadcast %316 : f32 to vector<8x8xf32>
    %318 = arith.mulf %317, %179 : vector<8x8xf32>
    %319 = arith.addf %315, %318 : vector<8x8xf32>
    %c124 = arith.constant 124 : index
    %320 = memref.load %arg1[%c124] : memref<144xf32, #tpu.memory_space<smem>>
    %321 = vector.broadcast %320 : f32 to vector<8x8xf32>
    %322 = arith.mulf %321, %181 : vector<8x8xf32>
    %323 = arith.addf %319, %322 : vector<8x8xf32>
    %c125 = arith.constant 125 : index
    %324 = memref.load %arg1[%c125] : memref<144xf32, #tpu.memory_space<smem>>
    %325 = vector.broadcast %324 : f32 to vector<8x8xf32>
    %326 = arith.mulf %325, %183 : vector<8x8xf32>
    %327 = arith.addf %323, %326 : vector<8x8xf32>
    %c0_111 = arith.constant 0 : index
    %c2_112 = arith.constant 2 : index
    %c0_113 = arith.constant 0 : index
    %c0_114 = arith.constant 0 : index
    %c0_115 = arith.constant 0 : index
    %c0_116 = arith.constant 0 : index
    %328 = vector.load %arg3[%c0_111, %c2_112, %c0_113, %c0_114, %c0_115, %c0_116] : memref<1x4x2x2x9x9xf32, #tpu.memory_space<vmem>>, vector<1x1x1x1x8x8xf32>
    %329 = vector.shape_cast %328 : vector<1x1x1x1x8x8xf32> to vector<8x8xf32>
    %c0_117 = arith.constant 0 : index
    %c2_118 = arith.constant 2 : index
    %c0_119 = arith.constant 0 : index
    %c1_120 = arith.constant 1 : index
    %c0_121 = arith.constant 0 : index
    %c0_122 = arith.constant 0 : index
    %330 = vector.load %arg3[%c0_117, %c2_118, %c0_119, %c1_120, %c0_121, %c0_122] : memref<1x4x2x2x9x9xf32, #tpu.memory_space<vmem>>, vector<1x1x1x1x8x8xf32>
    %331 = vector.shape_cast %330 : vector<1x1x1x1x8x8xf32> to vector<8x8xf32>
    %c0_123 = arith.constant 0 : index
    %c2_124 = arith.constant 2 : index
    %c0_125 = arith.constant 0 : index
    %c0_126 = arith.constant 0 : index
    %c0_127 = arith.constant 0 : index
    %c1_128 = arith.constant 1 : index
    %332 = vector.load %arg3[%c0_123, %c2_124, %c0_125, %c0_126, %c0_127, %c1_128] : memref<1x4x2x2x9x9xf32, #tpu.memory_space<vmem>>, vector<1x1x1x1x8x8xf32>
    %333 = vector.shape_cast %332 : vector<1x1x1x1x8x8xf32> to vector<8x8xf32>
    %c0_129 = arith.constant 0 : index
    %c2_130 = arith.constant 2 : index
    %c1_131 = arith.constant 1 : index
    %c0_132 = arith.constant 0 : index
    %c0_133 = arith.constant 0 : index
    %c0_134 = arith.constant 0 : index
    %334 = vector.load %arg3[%c0_129, %c2_130, %c1_131, %c0_132, %c0_133, %c0_134] : memref<1x4x2x2x9x9xf32, #tpu.memory_space<vmem>>, vector<1x1x1x1x8x8xf32>
    %335 = vector.shape_cast %334 : vector<1x1x1x1x8x8xf32> to vector<8x8xf32>
    %c0_135 = arith.constant 0 : index
    %c2_136 = arith.constant 2 : index
    %c1_137 = arith.constant 1 : index
    %c1_138 = arith.constant 1 : index
    %c0_139 = arith.constant 0 : index
    %c0_140 = arith.constant 0 : index
    %336 = vector.load %arg3[%c0_135, %c2_136, %c1_137, %c1_138, %c0_139, %c0_140] : memref<1x4x2x2x9x9xf32, #tpu.memory_space<vmem>>, vector<1x1x1x1x8x8xf32>
    %337 = vector.shape_cast %336 : vector<1x1x1x1x8x8xf32> to vector<8x8xf32>
    %c0_141 = arith.constant 0 : index
    %c2_142 = arith.constant 2 : index
    %c1_143 = arith.constant 1 : index
    %c0_144 = arith.constant 0 : index
    %c0_145 = arith.constant 0 : index
    %c1_146 = arith.constant 1 : index
    %338 = vector.load %arg3[%c0_141, %c2_142, %c1_143, %c0_144, %c0_145, %c1_146] : memref<1x4x2x2x9x9xf32, #tpu.memory_space<vmem>>, vector<1x1x1x1x8x8xf32>
    %339 = vector.shape_cast %338 : vector<1x1x1x1x8x8xf32> to vector<8x8xf32>
    %c0_147 = arith.constant 0 : index
    %c2_148 = arith.constant 2 : index
    %c0_149 = arith.constant 0 : index
    %c0_150 = arith.constant 0 : index
    %c1_151 = arith.constant 1 : index
    %c0_152 = arith.constant 0 : index
    %340 = vector.load %arg3[%c0_147, %c2_148, %c0_149, %c0_150, %c1_151, %c0_152] : memref<1x4x2x2x9x9xf32, #tpu.memory_space<vmem>>, vector<1x1x1x1x8x8xf32>
    %341 = vector.shape_cast %340 : vector<1x1x1x1x8x8xf32> to vector<8x8xf32>
    %c0_153 = arith.constant 0 : index
    %c2_154 = arith.constant 2 : index
    %c0_155 = arith.constant 0 : index
    %c1_156 = arith.constant 1 : index
    %c1_157 = arith.constant 1 : index
    %c0_158 = arith.constant 0 : index
    %342 = vector.load %arg3[%c0_153, %c2_154, %c0_155, %c1_156, %c1_157, %c0_158] : memref<1x4x2x2x9x9xf32, #tpu.memory_space<vmem>>, vector<1x1x1x1x8x8xf32>
    %343 = vector.shape_cast %342 : vector<1x1x1x1x8x8xf32> to vector<8x8xf32>
    %c0_159 = arith.constant 0 : index
    %c2_160 = arith.constant 2 : index
    %c0_161 = arith.constant 0 : index
    %c0_162 = arith.constant 0 : index
    %c1_163 = arith.constant 1 : index
    %c1_164 = arith.constant 1 : index
    %344 = vector.load %arg3[%c0_159, %c2_160, %c0_161, %c0_162, %c1_163, %c1_164] : memref<1x4x2x2x9x9xf32, #tpu.memory_space<vmem>>, vector<1x1x1x1x8x8xf32>
    %345 = vector.shape_cast %344 : vector<1x1x1x1x8x8xf32> to vector<8x8xf32>
    %c18 = arith.constant 18 : index
    %346 = memref.load %arg1[%c18] : memref<144xf32, #tpu.memory_space<smem>>
    %347 = vector.broadcast %346 : f32 to vector<8x8xf32>
    %348 = arith.mulf %347, %329 : vector<8x8xf32>
    %349 = arith.addf %219, %348 : vector<8x8xf32>
    %c19 = arith.constant 19 : index
    %350 = memref.load %arg1[%c19] : memref<144xf32, #tpu.memory_space<smem>>
    %351 = vector.broadcast %350 : f32 to vector<8x8xf32>
    %352 = arith.mulf %351, %331 : vector<8x8xf32>
    %353 = arith.addf %349, %352 : vector<8x8xf32>
    %c20 = arith.constant 20 : index
    %354 = memref.load %arg1[%c20] : memref<144xf32, #tpu.memory_space<smem>>
    %355 = vector.broadcast %354 : f32 to vector<8x8xf32>
    %356 = arith.mulf %355, %333 : vector<8x8xf32>
    %357 = arith.addf %353, %356 : vector<8x8xf32>
    %c21 = arith.constant 21 : index
    %358 = memref.load %arg1[%c21] : memref<144xf32, #tpu.memory_space<smem>>
    %359 = vector.broadcast %358 : f32 to vector<8x8xf32>
    %360 = arith.mulf %359, %335 : vector<8x8xf32>
    %361 = arith.addf %357, %360 : vector<8x8xf32>
    %c22 = arith.constant 22 : index
    %362 = memref.load %arg1[%c22] : memref<144xf32, #tpu.memory_space<smem>>
    %363 = vector.broadcast %362 : f32 to vector<8x8xf32>
    %364 = arith.mulf %363, %337 : vector<8x8xf32>
    %365 = arith.addf %361, %364 : vector<8x8xf32>
    %c23 = arith.constant 23 : index
    %366 = memref.load %arg1[%c23] : memref<144xf32, #tpu.memory_space<smem>>
    %367 = vector.broadcast %366 : f32 to vector<8x8xf32>
    %368 = arith.mulf %367, %339 : vector<8x8xf32>
    %369 = arith.addf %365, %368 : vector<8x8xf32>
    %c24 = arith.constant 24 : index
    %370 = memref.load %arg1[%c24] : memref<144xf32, #tpu.memory_space<smem>>
    %371 = vector.broadcast %370 : f32 to vector<8x8xf32>
    %372 = arith.mulf %371, %341 : vector<8x8xf32>
    %373 = arith.addf %369, %372 : vector<8x8xf32>
    %c25 = arith.constant 25 : index
    %374 = memref.load %arg1[%c25] : memref<144xf32, #tpu.memory_space<smem>>
    %375 = vector.broadcast %374 : f32 to vector<8x8xf32>
    %376 = arith.mulf %375, %343 : vector<8x8xf32>
    %377 = arith.addf %373, %376 : vector<8x8xf32>
    %c26 = arith.constant 26 : index
    %378 = memref.load %arg1[%c26] : memref<144xf32, #tpu.memory_space<smem>>
    %379 = vector.broadcast %378 : f32 to vector<8x8xf32>
    %380 = arith.mulf %379, %345 : vector<8x8xf32>
    %381 = arith.addf %377, %380 : vector<8x8xf32>
    %c54 = arith.constant 54 : index
    %382 = memref.load %arg1[%c54] : memref<144xf32, #tpu.memory_space<smem>>
    %383 = vector.broadcast %382 : f32 to vector<8x8xf32>
    %384 = arith.mulf %383, %329 : vector<8x8xf32>
    %385 = arith.addf %255, %384 : vector<8x8xf32>
    %c55 = arith.constant 55 : index
    %386 = memref.load %arg1[%c55] : memref<144xf32, #tpu.memory_space<smem>>
    %387 = vector.broadcast %386 : f32 to vector<8x8xf32>
    %388 = arith.mulf %387, %331 : vector<8x8xf32>
    %389 = arith.addf %385, %388 : vector<8x8xf32>
    %c56 = arith.constant 56 : index
    %390 = memref.load %arg1[%c56] : memref<144xf32, #tpu.memory_space<smem>>
    %391 = vector.broadcast %390 : f32 to vector<8x8xf32>
    %392 = arith.mulf %391, %333 : vector<8x8xf32>
    %393 = arith.addf %389, %392 : vector<8x8xf32>
    %c57 = arith.constant 57 : index
    %394 = memref.load %arg1[%c57] : memref<144xf32, #tpu.memory_space<smem>>
    %395 = vector.broadcast %394 : f32 to vector<8x8xf32>
    %396 = arith.mulf %395, %335 : vector<8x8xf32>
    %397 = arith.addf %393, %396 : vector<8x8xf32>
    %c58 = arith.constant 58 : index
    %398 = memref.load %arg1[%c58] : memref<144xf32, #tpu.memory_space<smem>>
    %399 = vector.broadcast %398 : f32 to vector<8x8xf32>
    %400 = arith.mulf %399, %337 : vector<8x8xf32>
    %401 = arith.addf %397, %400 : vector<8x8xf32>
    %c59 = arith.constant 59 : index
    %402 = memref.load %arg1[%c59] : memref<144xf32, #tpu.memory_space<smem>>
    %403 = vector.broadcast %402 : f32 to vector<8x8xf32>
    %404 = arith.mulf %403, %339 : vector<8x8xf32>
    %405 = arith.addf %401, %404 : vector<8x8xf32>
    %c60 = arith.constant 60 : index
    %406 = memref.load %arg1[%c60] : memref<144xf32, #tpu.memory_space<smem>>
    %407 = vector.broadcast %406 : f32 to vector<8x8xf32>
    %408 = arith.mulf %407, %341 : vector<8x8xf32>
    %409 = arith.addf %405, %408 : vector<8x8xf32>
    %c61 = arith.constant 61 : index
    %410 = memref.load %arg1[%c61] : memref<144xf32, #tpu.memory_space<smem>>
    %411 = vector.broadcast %410 : f32 to vector<8x8xf32>
    %412 = arith.mulf %411, %343 : vector<8x8xf32>
    %413 = arith.addf %409, %412 : vector<8x8xf32>
    %c62 = arith.constant 62 : index
    %414 = memref.load %arg1[%c62] : memref<144xf32, #tpu.memory_space<smem>>
    %415 = vector.broadcast %414 : f32 to vector<8x8xf32>
    %416 = arith.mulf %415, %345 : vector<8x8xf32>
    %417 = arith.addf %413, %416 : vector<8x8xf32>
    %c90 = arith.constant 90 : index
    %418 = memref.load %arg1[%c90] : memref<144xf32, #tpu.memory_space<smem>>
    %419 = vector.broadcast %418 : f32 to vector<8x8xf32>
    %420 = arith.mulf %419, %329 : vector<8x8xf32>
    %421 = arith.addf %291, %420 : vector<8x8xf32>
    %c91 = arith.constant 91 : index
    %422 = memref.load %arg1[%c91] : memref<144xf32, #tpu.memory_space<smem>>
    %423 = vector.broadcast %422 : f32 to vector<8x8xf32>
    %424 = arith.mulf %423, %331 : vector<8x8xf32>
    %425 = arith.addf %421, %424 : vector<8x8xf32>
    %c92 = arith.constant 92 : index
    %426 = memref.load %arg1[%c92] : memref<144xf32, #tpu.memory_space<smem>>
    %427 = vector.broadcast %426 : f32 to vector<8x8xf32>
    %428 = arith.mulf %427, %333 : vector<8x8xf32>
    %429 = arith.addf %425, %428 : vector<8x8xf32>
    %c93 = arith.constant 93 : index
    %430 = memref.load %arg1[%c93] : memref<144xf32, #tpu.memory_space<smem>>
    %431 = vector.broadcast %430 : f32 to vector<8x8xf32>
    %432 = arith.mulf %431, %335 : vector<8x8xf32>
    %433 = arith.addf %429, %432 : vector<8x8xf32>
    %c94 = arith.constant 94 : index
    %434 = memref.load %arg1[%c94] : memref<144xf32, #tpu.memory_space<smem>>
    %435 = vector.broadcast %434 : f32 to vector<8x8xf32>
    %436 = arith.mulf %435, %337 : vector<8x8xf32>
    %437 = arith.addf %433, %436 : vector<8x8xf32>
    %c95 = arith.constant 95 : index
    %438 = memref.load %arg1[%c95] : memref<144xf32, #tpu.memory_space<smem>>
    %439 = vector.broadcast %438 : f32 to vector<8x8xf32>
    %440 = arith.mulf %439, %339 : vector<8x8xf32>
    %441 = arith.addf %437, %440 : vector<8x8xf32>
    %c96 = arith.constant 96 : index
    %442 = memref.load %arg1[%c96] : memref<144xf32, #tpu.memory_space<smem>>
    %443 = vector.broadcast %442 : f32 to vector<8x8xf32>
    %444 = arith.mulf %443, %341 : vector<8x8xf32>
    %445 = arith.addf %441, %444 : vector<8x8xf32>
    %c97 = arith.constant 97 : index
    %446 = memref.load %arg1[%c97] : memref<144xf32, #tpu.memory_space<smem>>
    %447 = vector.broadcast %446 : f32 to vector<8x8xf32>
    %448 = arith.mulf %447, %343 : vector<8x8xf32>
    %449 = arith.addf %445, %448 : vector<8x8xf32>
    %c98 = arith.constant 98 : index
    %450 = memref.load %arg1[%c98] : memref<144xf32, #tpu.memory_space<smem>>
    %451 = vector.broadcast %450 : f32 to vector<8x8xf32>
    %452 = arith.mulf %451, %345 : vector<8x8xf32>
    %453 = arith.addf %449, %452 : vector<8x8xf32>
    %c126 = arith.constant 126 : index
    %454 = memref.load %arg1[%c126] : memref<144xf32, #tpu.memory_space<smem>>
    %455 = vector.broadcast %454 : f32 to vector<8x8xf32>
    %456 = arith.mulf %455, %329 : vector<8x8xf32>
    %457 = arith.addf %327, %456 : vector<8x8xf32>
    %c127 = arith.constant 127 : index
    %458 = memref.load %arg1[%c127] : memref<144xf32, #tpu.memory_space<smem>>
    %459 = vector.broadcast %458 : f32 to vector<8x8xf32>
    %460 = arith.mulf %459, %331 : vector<8x8xf32>
    %461 = arith.addf %457, %460 : vector<8x8xf32>
    %c128 = arith.constant 128 : index
    %462 = memref.load %arg1[%c128] : memref<144xf32, #tpu.memory_space<smem>>
    %463 = vector.broadcast %462 : f32 to vector<8x8xf32>
    %464 = arith.mulf %463, %333 : vector<8x8xf32>
    %465 = arith.addf %461, %464 : vector<8x8xf32>
    %c129 = arith.constant 129 : index
    %466 = memref.load %arg1[%c129] : memref<144xf32, #tpu.memory_space<smem>>
    %467 = vector.broadcast %466 : f32 to vector<8x8xf32>
    %468 = arith.mulf %467, %335 : vector<8x8xf32>
    %469 = arith.addf %465, %468 : vector<8x8xf32>
    %c130 = arith.constant 130 : index
    %470 = memref.load %arg1[%c130] : memref<144xf32, #tpu.memory_space<smem>>
    %471 = vector.broadcast %470 : f32 to vector<8x8xf32>
    %472 = arith.mulf %471, %337 : vector<8x8xf32>
    %473 = arith.addf %469, %472 : vector<8x8xf32>
    %c131 = arith.constant 131 : index
    %474 = memref.load %arg1[%c131] : memref<144xf32, #tpu.memory_space<smem>>
    %475 = vector.broadcast %474 : f32 to vector<8x8xf32>
    %476 = arith.mulf %475, %339 : vector<8x8xf32>
    %477 = arith.addf %473, %476 : vector<8x8xf32>
    %c132 = arith.constant 132 : index
    %478 = memref.load %arg1[%c132] : memref<144xf32, #tpu.memory_space<smem>>
    %479 = vector.broadcast %478 : f32 to vector<8x8xf32>
    %480 = arith.mulf %479, %341 : vector<8x8xf32>
    %481 = arith.addf %477, %480 : vector<8x8xf32>
    %c133 = arith.constant 133 : index
    %482 = memref.load %arg1[%c133] : memref<144xf32, #tpu.memory_space<smem>>
    %483 = vector.broadcast %482 : f32 to vector<8x8xf32>
    %484 = arith.mulf %483, %343 : vector<8x8xf32>
    %485 = arith.addf %481, %484 : vector<8x8xf32>
    %c134 = arith.constant 134 : index
    %486 = memref.load %arg1[%c134] : memref<144xf32, #tpu.memory_space<smem>>
    %487 = vector.broadcast %486 : f32 to vector<8x8xf32>
    %488 = arith.mulf %487, %345 : vector<8x8xf32>
    %489 = arith.addf %485, %488 : vector<8x8xf32>
    %c0_165 = arith.constant 0 : index
    %c3_166 = arith.constant 3 : index
    %c0_167 = arith.constant 0 : index
    %c0_168 = arith.constant 0 : index
    %c0_169 = arith.constant 0 : index
    %c0_170 = arith.constant 0 : index
    %490 = vector.load %arg3[%c0_165, %c3_166, %c0_167, %c0_168, %c0_169, %c0_170] : memref<1x4x2x2x9x9xf32, #tpu.memory_space<vmem>>, vector<1x1x1x1x8x8xf32>
    %491 = vector.shape_cast %490 : vector<1x1x1x1x8x8xf32> to vector<8x8xf32>
    %c0_171 = arith.constant 0 : index
    %c3_172 = arith.constant 3 : index
    %c0_173 = arith.constant 0 : index
    %c1_174 = arith.constant 1 : index
    %c0_175 = arith.constant 0 : index
    %c0_176 = arith.constant 0 : index
    %492 = vector.load %arg3[%c0_171, %c3_172, %c0_173, %c1_174, %c0_175, %c0_176] : memref<1x4x2x2x9x9xf32, #tpu.memory_space<vmem>>, vector<1x1x1x1x8x8xf32>
    %493 = vector.shape_cast %492 : vector<1x1x1x1x8x8xf32> to vector<8x8xf32>
    %c0_177 = arith.constant 0 : index
    %c3_178 = arith.constant 3 : index
    %c0_179 = arith.constant 0 : index
    %c0_180 = arith.constant 0 : index
    %c0_181 = arith.constant 0 : index
    %c1_182 = arith.constant 1 : index
    %494 = vector.load %arg3[%c0_177, %c3_178, %c0_179, %c0_180, %c0_181, %c1_182] : memref<1x4x2x2x9x9xf32, #tpu.memory_space<vmem>>, vector<1x1x1x1x8x8xf32>
    %495 = vector.shape_cast %494 : vector<1x1x1x1x8x8xf32> to vector<8x8xf32>
    %c0_183 = arith.constant 0 : index
    %c3_184 = arith.constant 3 : index
    %c1_185 = arith.constant 1 : index
    %c0_186 = arith.constant 0 : index
    %c0_187 = arith.constant 0 : index
    %c0_188 = arith.constant 0 : index
    %496 = vector.load %arg3[%c0_183, %c3_184, %c1_185, %c0_186, %c0_187, %c0_188] : memref<1x4x2x2x9x9xf32, #tpu.memory_space<vmem>>, vector<1x1x1x1x8x8xf32>
    %497 = vector.shape_cast %496 : vector<1x1x1x1x8x8xf32> to vector<8x8xf32>
    %c0_189 = arith.constant 0 : index
    %c3_190 = arith.constant 3 : index
    %c1_191 = arith.constant 1 : index
    %c1_192 = arith.constant 1 : index
    %c0_193 = arith.constant 0 : index
    %c0_194 = arith.constant 0 : index
    %498 = vector.load %arg3[%c0_189, %c3_190, %c1_191, %c1_192, %c0_193, %c0_194] : memref<1x4x2x2x9x9xf32, #tpu.memory_space<vmem>>, vector<1x1x1x1x8x8xf32>
    %499 = vector.shape_cast %498 : vector<1x1x1x1x8x8xf32> to vector<8x8xf32>
    %c0_195 = arith.constant 0 : index
    %c3_196 = arith.constant 3 : index
    %c1_197 = arith.constant 1 : index
    %c0_198 = arith.constant 0 : index
    %c0_199 = arith.constant 0 : index
    %c1_200 = arith.constant 1 : index
    %500 = vector.load %arg3[%c0_195, %c3_196, %c1_197, %c0_198, %c0_199, %c1_200] : memref<1x4x2x2x9x9xf32, #tpu.memory_space<vmem>>, vector<1x1x1x1x8x8xf32>
    %501 = vector.shape_cast %500 : vector<1x1x1x1x8x8xf32> to vector<8x8xf32>
    %c0_201 = arith.constant 0 : index
    %c3_202 = arith.constant 3 : index
    %c0_203 = arith.constant 0 : index
    %c0_204 = arith.constant 0 : index
    %c1_205 = arith.constant 1 : index
    %c0_206 = arith.constant 0 : index
    %502 = vector.load %arg3[%c0_201, %c3_202, %c0_203, %c0_204, %c1_205, %c0_206] : memref<1x4x2x2x9x9xf32, #tpu.memory_space<vmem>>, vector<1x1x1x1x8x8xf32>
    %503 = vector.shape_cast %502 : vector<1x1x1x1x8x8xf32> to vector<8x8xf32>
    %c0_207 = arith.constant 0 : index
    %c3_208 = arith.constant 3 : index
    %c0_209 = arith.constant 0 : index
    %c1_210 = arith.constant 1 : index
    %c1_211 = arith.constant 1 : index
    %c0_212 = arith.constant 0 : index
    %504 = vector.load %arg3[%c0_207, %c3_208, %c0_209, %c1_210, %c1_211, %c0_212] : memref<1x4x2x2x9x9xf32, #tpu.memory_space<vmem>>, vector<1x1x1x1x8x8xf32>
    %505 = vector.shape_cast %504 : vector<1x1x1x1x8x8xf32> to vector<8x8xf32>
    %c0_213 = arith.constant 0 : index
    %c3_214 = arith.constant 3 : index
    %c0_215 = arith.constant 0 : index
    %c0_216 = arith.constant 0 : index
    %c1_217 = arith.constant 1 : index
    %c1_218 = arith.constant 1 : index
    %506 = vector.load %arg3[%c0_213, %c3_214, %c0_215, %c0_216, %c1_217, %c1_218] : memref<1x4x2x2x9x9xf32, #tpu.memory_space<vmem>>, vector<1x1x1x1x8x8xf32>
    %507 = vector.shape_cast %506 : vector<1x1x1x1x8x8xf32> to vector<8x8xf32>
    %c27 = arith.constant 27 : index
    %508 = memref.load %arg1[%c27] : memref<144xf32, #tpu.memory_space<smem>>
    %509 = vector.broadcast %508 : f32 to vector<8x8xf32>
    %510 = arith.mulf %509, %491 : vector<8x8xf32>
    %511 = arith.addf %381, %510 : vector<8x8xf32>
    %c28 = arith.constant 28 : index
    %512 = memref.load %arg1[%c28] : memref<144xf32, #tpu.memory_space<smem>>
    %513 = vector.broadcast %512 : f32 to vector<8x8xf32>
    %514 = arith.mulf %513, %493 : vector<8x8xf32>
    %515 = arith.addf %511, %514 : vector<8x8xf32>
    %c29 = arith.constant 29 : index
    %516 = memref.load %arg1[%c29] : memref<144xf32, #tpu.memory_space<smem>>
    %517 = vector.broadcast %516 : f32 to vector<8x8xf32>
    %518 = arith.mulf %517, %495 : vector<8x8xf32>
    %519 = arith.addf %515, %518 : vector<8x8xf32>
    %c30 = arith.constant 30 : index
    %520 = memref.load %arg1[%c30] : memref<144xf32, #tpu.memory_space<smem>>
    %521 = vector.broadcast %520 : f32 to vector<8x8xf32>
    %522 = arith.mulf %521, %497 : vector<8x8xf32>
    %523 = arith.addf %519, %522 : vector<8x8xf32>
    %c31 = arith.constant 31 : index
    %524 = memref.load %arg1[%c31] : memref<144xf32, #tpu.memory_space<smem>>
    %525 = vector.broadcast %524 : f32 to vector<8x8xf32>
    %526 = arith.mulf %525, %499 : vector<8x8xf32>
    %527 = arith.addf %523, %526 : vector<8x8xf32>
    %c32 = arith.constant 32 : index
    %528 = memref.load %arg1[%c32] : memref<144xf32, #tpu.memory_space<smem>>
    %529 = vector.broadcast %528 : f32 to vector<8x8xf32>
    %530 = arith.mulf %529, %501 : vector<8x8xf32>
    %531 = arith.addf %527, %530 : vector<8x8xf32>
    %c33 = arith.constant 33 : index
    %532 = memref.load %arg1[%c33] : memref<144xf32, #tpu.memory_space<smem>>
    %533 = vector.broadcast %532 : f32 to vector<8x8xf32>
    %534 = arith.mulf %533, %503 : vector<8x8xf32>
    %535 = arith.addf %531, %534 : vector<8x8xf32>
    %c34 = arith.constant 34 : index
    %536 = memref.load %arg1[%c34] : memref<144xf32, #tpu.memory_space<smem>>
    %537 = vector.broadcast %536 : f32 to vector<8x8xf32>
    %538 = arith.mulf %537, %505 : vector<8x8xf32>
    %539 = arith.addf %535, %538 : vector<8x8xf32>
    %c35 = arith.constant 35 : index
    %540 = memref.load %arg1[%c35] : memref<144xf32, #tpu.memory_space<smem>>
    %541 = vector.broadcast %540 : f32 to vector<8x8xf32>
    %542 = arith.mulf %541, %507 : vector<8x8xf32>
    %543 = arith.addf %539, %542 : vector<8x8xf32>
    %c63 = arith.constant 63 : index
    %544 = memref.load %arg1[%c63] : memref<144xf32, #tpu.memory_space<smem>>
    %545 = vector.broadcast %544 : f32 to vector<8x8xf32>
    %546 = arith.mulf %545, %491 : vector<8x8xf32>
    %547 = arith.addf %417, %546 : vector<8x8xf32>
    %c64 = arith.constant 64 : index
    %548 = memref.load %arg1[%c64] : memref<144xf32, #tpu.memory_space<smem>>
    %549 = vector.broadcast %548 : f32 to vector<8x8xf32>
    %550 = arith.mulf %549, %493 : vector<8x8xf32>
    %551 = arith.addf %547, %550 : vector<8x8xf32>
    %c65 = arith.constant 65 : index
    %552 = memref.load %arg1[%c65] : memref<144xf32, #tpu.memory_space<smem>>
    %553 = vector.broadcast %552 : f32 to vector<8x8xf32>
    %554 = arith.mulf %553, %495 : vector<8x8xf32>
    %555 = arith.addf %551, %554 : vector<8x8xf32>
    %c66 = arith.constant 66 : index
    %556 = memref.load %arg1[%c66] : memref<144xf32, #tpu.memory_space<smem>>
    %557 = vector.broadcast %556 : f32 to vector<8x8xf32>
    %558 = arith.mulf %557, %497 : vector<8x8xf32>
    %559 = arith.addf %555, %558 : vector<8x8xf32>
    %c67 = arith.constant 67 : index
    %560 = memref.load %arg1[%c67] : memref<144xf32, #tpu.memory_space<smem>>
    %561 = vector.broadcast %560 : f32 to vector<8x8xf32>
    %562 = arith.mulf %561, %499 : vector<8x8xf32>
    %563 = arith.addf %559, %562 : vector<8x8xf32>
    %c68 = arith.constant 68 : index
    %564 = memref.load %arg1[%c68] : memref<144xf32, #tpu.memory_space<smem>>
    %565 = vector.broadcast %564 : f32 to vector<8x8xf32>
    %566 = arith.mulf %565, %501 : vector<8x8xf32>
    %567 = arith.addf %563, %566 : vector<8x8xf32>
    %c69 = arith.constant 69 : index
    %568 = memref.load %arg1[%c69] : memref<144xf32, #tpu.memory_space<smem>>
    %569 = vector.broadcast %568 : f32 to vector<8x8xf32>
    %570 = arith.mulf %569, %503 : vector<8x8xf32>
    %571 = arith.addf %567, %570 : vector<8x8xf32>
    %c70 = arith.constant 70 : index
    %572 = memref.load %arg1[%c70] : memref<144xf32, #tpu.memory_space<smem>>
    %573 = vector.broadcast %572 : f32 to vector<8x8xf32>
    %574 = arith.mulf %573, %505 : vector<8x8xf32>
    %575 = arith.addf %571, %574 : vector<8x8xf32>
    %c71 = arith.constant 71 : index
    %576 = memref.load %arg1[%c71] : memref<144xf32, #tpu.memory_space<smem>>
    %577 = vector.broadcast %576 : f32 to vector<8x8xf32>
    %578 = arith.mulf %577, %507 : vector<8x8xf32>
    %579 = arith.addf %575, %578 : vector<8x8xf32>
    %c99 = arith.constant 99 : index
    %580 = memref.load %arg1[%c99] : memref<144xf32, #tpu.memory_space<smem>>
    %581 = vector.broadcast %580 : f32 to vector<8x8xf32>
    %582 = arith.mulf %581, %491 : vector<8x8xf32>
    %583 = arith.addf %453, %582 : vector<8x8xf32>
    %c100 = arith.constant 100 : index
    %584 = memref.load %arg1[%c100] : memref<144xf32, #tpu.memory_space<smem>>
    %585 = vector.broadcast %584 : f32 to vector<8x8xf32>
    %586 = arith.mulf %585, %493 : vector<8x8xf32>
    %587 = arith.addf %583, %586 : vector<8x8xf32>
    %c101 = arith.constant 101 : index
    %588 = memref.load %arg1[%c101] : memref<144xf32, #tpu.memory_space<smem>>
    %589 = vector.broadcast %588 : f32 to vector<8x8xf32>
    %590 = arith.mulf %589, %495 : vector<8x8xf32>
    %591 = arith.addf %587, %590 : vector<8x8xf32>
    %c102 = arith.constant 102 : index
    %592 = memref.load %arg1[%c102] : memref<144xf32, #tpu.memory_space<smem>>
    %593 = vector.broadcast %592 : f32 to vector<8x8xf32>
    %594 = arith.mulf %593, %497 : vector<8x8xf32>
    %595 = arith.addf %591, %594 : vector<8x8xf32>
    %c103 = arith.constant 103 : index
    %596 = memref.load %arg1[%c103] : memref<144xf32, #tpu.memory_space<smem>>
    %597 = vector.broadcast %596 : f32 to vector<8x8xf32>
    %598 = arith.mulf %597, %499 : vector<8x8xf32>
    %599 = arith.addf %595, %598 : vector<8x8xf32>
    %c104 = arith.constant 104 : index
    %600 = memref.load %arg1[%c104] : memref<144xf32, #tpu.memory_space<smem>>
    %601 = vector.broadcast %600 : f32 to vector<8x8xf32>
    %602 = arith.mulf %601, %501 : vector<8x8xf32>
    %603 = arith.addf %599, %602 : vector<8x8xf32>
    %c105 = arith.constant 105 : index
    %604 = memref.load %arg1[%c105] : memref<144xf32, #tpu.memory_space<smem>>
    %605 = vector.broadcast %604 : f32 to vector<8x8xf32>
    %606 = arith.mulf %605, %503 : vector<8x8xf32>
    %607 = arith.addf %603, %606 : vector<8x8xf32>
    %c106 = arith.constant 106 : index
    %608 = memref.load %arg1[%c106] : memref<144xf32, #tpu.memory_space<smem>>
    %609 = vector.broadcast %608 : f32 to vector<8x8xf32>
    %610 = arith.mulf %609, %505 : vector<8x8xf32>
    %611 = arith.addf %607, %610 : vector<8x8xf32>
    %c107 = arith.constant 107 : index
    %612 = memref.load %arg1[%c107] : memref<144xf32, #tpu.memory_space<smem>>
    %613 = vector.broadcast %612 : f32 to vector<8x8xf32>
    %614 = arith.mulf %613, %507 : vector<8x8xf32>
    %615 = arith.addf %611, %614 : vector<8x8xf32>
    %c135 = arith.constant 135 : index
    %616 = memref.load %arg1[%c135] : memref<144xf32, #tpu.memory_space<smem>>
    %617 = vector.broadcast %616 : f32 to vector<8x8xf32>
    %618 = arith.mulf %617, %491 : vector<8x8xf32>
    %619 = arith.addf %489, %618 : vector<8x8xf32>
    %c136 = arith.constant 136 : index
    %620 = memref.load %arg1[%c136] : memref<144xf32, #tpu.memory_space<smem>>
    %621 = vector.broadcast %620 : f32 to vector<8x8xf32>
    %622 = arith.mulf %621, %493 : vector<8x8xf32>
    %623 = arith.addf %619, %622 : vector<8x8xf32>
    %c137 = arith.constant 137 : index
    %624 = memref.load %arg1[%c137] : memref<144xf32, #tpu.memory_space<smem>>
    %625 = vector.broadcast %624 : f32 to vector<8x8xf32>
    %626 = arith.mulf %625, %495 : vector<8x8xf32>
    %627 = arith.addf %623, %626 : vector<8x8xf32>
    %c138 = arith.constant 138 : index
    %628 = memref.load %arg1[%c138] : memref<144xf32, #tpu.memory_space<smem>>
    %629 = vector.broadcast %628 : f32 to vector<8x8xf32>
    %630 = arith.mulf %629, %497 : vector<8x8xf32>
    %631 = arith.addf %627, %630 : vector<8x8xf32>
    %c139 = arith.constant 139 : index
    %632 = memref.load %arg1[%c139] : memref<144xf32, #tpu.memory_space<smem>>
    %633 = vector.broadcast %632 : f32 to vector<8x8xf32>
    %634 = arith.mulf %633, %499 : vector<8x8xf32>
    %635 = arith.addf %631, %634 : vector<8x8xf32>
    %c140 = arith.constant 140 : index
    %636 = memref.load %arg1[%c140] : memref<144xf32, #tpu.memory_space<smem>>
    %637 = vector.broadcast %636 : f32 to vector<8x8xf32>
    %638 = arith.mulf %637, %501 : vector<8x8xf32>
    %639 = arith.addf %635, %638 : vector<8x8xf32>
    %c141 = arith.constant 141 : index
    %640 = memref.load %arg1[%c141] : memref<144xf32, #tpu.memory_space<smem>>
    %641 = vector.broadcast %640 : f32 to vector<8x8xf32>
    %642 = arith.mulf %641, %503 : vector<8x8xf32>
    %643 = arith.addf %639, %642 : vector<8x8xf32>
    %c142 = arith.constant 142 : index
    %644 = memref.load %arg1[%c142] : memref<144xf32, #tpu.memory_space<smem>>
    %645 = vector.broadcast %644 : f32 to vector<8x8xf32>
    %646 = arith.mulf %645, %505 : vector<8x8xf32>
    %647 = arith.addf %643, %646 : vector<8x8xf32>
    %c143 = arith.constant 143 : index
    %648 = memref.load %arg1[%c143] : memref<144xf32, #tpu.memory_space<smem>>
    %649 = vector.broadcast %648 : f32 to vector<8x8xf32>
    %650 = arith.mulf %649, %507 : vector<8x8xf32>
    %651 = arith.addf %647, %650 : vector<8x8xf32>
    %c0_219 = arith.constant 0 : index
    %652 = memref.load %arg2[%c0_219] : memref<4xf32, #tpu.memory_space<smem>>
    %653 = vector.broadcast %652 : f32 to vector<8x8xf32>
    %654 = arith.addf %543, %653 : vector<8x8xf32>
    %c0_220 = arith.constant 0 : index
    %c0_221 = arith.constant 0 : index
    %c0_222 = arith.constant 0 : index
    %c0_223 = arith.constant 0 : index
    %655 = vector.load %arg4[%c0_220, %c0_221, %c0_222, %c0_223] : memref<1x4x8x8xf32, #tpu.memory_space<vmem>>, vector<1x1x8x8xf32>
    %656 = vector.shape_cast %655 : vector<1x1x8x8xf32> to vector<8x8xf32>
    %657 = vector.shape_cast %654 : vector<8x8xf32> to vector<1x1x8x8xf32>
    tpu.vector_store %arg4[%c0_220, %c0_221, %c0_222, %c0_223], %657 {strides = array<i32>} : memref<1x4x8x8xf32, #tpu.memory_space<vmem>>, vector<1x1x8x8xf32>,
    %c1_224 = arith.constant 1 : index
    %658 = memref.load %arg2[%c1_224] : memref<4xf32, #tpu.memory_space<smem>>
    %659 = vector.broadcast %658 : f32 to vector<8x8xf32>
    %660 = arith.addf %579, %659 : vector<8x8xf32>
    %c0_225 = arith.constant 0 : index
    %c1_226 = arith.constant 1 : index
    %c0_227 = arith.constant 0 : index
    %c0_228 = arith.constant 0 : index
    %661 = vector.load %arg4[%c0_225, %c1_226, %c0_227, %c0_228] : memref<1x4x8x8xf32, #tpu.memory_space<vmem>>, vector<1x1x8x8xf32>
    %662 = vector.shape_cast %661 : vector<1x1x8x8xf32> to vector<8x8xf32>
    %663 = vector.shape_cast %660 : vector<8x8xf32> to vector<1x1x8x8xf32>
    tpu.vector_store %arg4[%c0_225, %c1_226, %c0_227, %c0_228], %663 {strides = array<i32>} : memref<1x4x8x8xf32, #tpu.memory_space<vmem>>, vector<1x1x8x8xf32>,
    %c2_229 = arith.constant 2 : index
    %664 = memref.load %arg2[%c2_229] : memref<4xf32, #tpu.memory_space<smem>>
    %665 = vector.broadcast %664 : f32 to vector<8x8xf32>
    %666 = arith.addf %615, %665 : vector<8x8xf32>
    %c0_230 = arith.constant 0 : index
    %c2_231 = arith.constant 2 : index
    %c0_232 = arith.constant 0 : index
    %c0_233 = arith.constant 0 : index
    %667 = vector.load %arg4[%c0_230, %c2_231, %c0_232, %c0_233] : memref<1x4x8x8xf32, #tpu.memory_space<vmem>>, vector<1x1x8x8xf32>
    %668 = vector.shape_cast %667 : vector<1x1x8x8xf32> to vector<8x8xf32>
    %669 = vector.shape_cast %666 : vector<8x8xf32> to vector<1x1x8x8xf32>
    tpu.vector_store %arg4[%c0_230, %c2_231, %c0_232, %c0_233], %669 {strides = array<i32>} : memref<1x4x8x8xf32, #tpu.memory_space<vmem>>, vector<1x1x8x8xf32>,
    %c3_234 = arith.constant 3 : index
    %670 = memref.load %arg2[%c3_234] : memref<4xf32, #tpu.memory_space<smem>>
    %671 = vector.broadcast %670 : f32 to vector<8x8xf32>
    %672 = arith.addf %651, %671 : vector<8x8xf32>
    %c0_235 = arith.constant 0 : index
    %c3_236 = arith.constant 3 : index
    %c0_237 = arith.constant 0 : index
    %c0_238 = arith.constant 0 : index
    %673 = vector.load %arg4[%c0_235, %c3_236, %c0_237, %c0_238] : memref<1x4x8x8xf32, #tpu.memory_space<vmem>>, vector<1x1x8x8xf32>
    %674 = vector.shape_cast %673 : vector<1x1x8x8xf32> to vector<8x8xf32>
    %675 = vector.shape_cast %672 : vector<8x8xf32> to vector<1x1x8x8xf32>
    tpu.vector_store %arg4[%c0_235, %c3_236, %c0_237, %c0_238], %675 {strides = array<i32>} : memref<1x4x8x8xf32, #tpu.memory_space<vmem>>, vector<1x1x8x8xf32>,
    return
  }
  func.func @transform_0(%arg0: i32) -> i32 {
    %c0_i32 = arith.constant 0 : i32
    %c0_i32_0 = arith.constant 0 : i32
    return %c0_i32 : i32
  }
  func.func @transform_1(%arg0: i32) -> i32 {
    %c0_i32 = arith.constant 0 : i32
    %c0_i32_0 = arith.constant 0 : i32
    return %c0_i32 : i32
  }
  func.func @transform_2(%arg0: i32) -> (i32, i32, i32, i32, i32, i32) {
    %c0_i32 = arith.constant 0 : i32
    %c0_i32_0 = arith.constant 0 : i32
    %c0_i32_1 = arith.constant 0 : i32
    %c0_i32_2 = arith.constant 0 : i32
    %c0_i32_3 = arith.constant 0 : i32
    %c0_i32_4 = arith.constant 0 : i32
    return %arg0, %c0_i32, %c0_i32_0, %c0_i32_1, %c0_i32_2, %c0_i32_3 : i32, i32, i32, i32, i32, i32
  }
  func.func @transform_3(%arg0: i32) -> (i32, i32, i32, i32) {
    %c0_i32 = arith.constant 0 : i32
    %c0_i32_0 = arith.constant 0 : i32
    %c0_i32_1 = arith.constant 0 : i32
    %c0_i32_2 = arith.constant 0 : i32
    return %arg0, %c0_i32, %c0_i32_0, %c0_i32_1 : i32, i32, i32, i32
  }
}

</mosaic_0001>

<bundles_post_ra>
// kernel: downsample_forward.1
= control target key start
LH: loop header
LB: loop body
LE: loop exit
PB: predicated region body
PF: predicated region fallthrough
CT: control target
= control target key end

     0   :  { %8 = vsyncpa [#allocation4], 0  ;;  %s2126_s0 = inlined_call_operand.vmem [shape: f32[144], index: 0, kind: input, shape index: {}]   ;;  %s2127_s1 = inlined_call_operand.vmem [shape: f32[4], index: 1, kind: input, shape index: {}]   ;;  %s2128_s2 = inlined_call_operand.vmem [shape: f32[2,4,2,2,9,9], index: 2, kind: input, shape index: {}]   ;;  %s2129_s3 = inlined_call_operand.hbm [shape: f32[2,4,8,8], index: 3, kind: output, shape index: {}]  }
   0x1   :  { %9 = vsyncpa [#allocation6], 0 }
   0x2   :  { %10 = vsyncpa [#allocation3], 0 }
   0x3   :  { %12 = vsyncpa [#allocation3 + $0x1], 0  ;;  %s1501_s12 = smov 0   ;;  %s1503_s13 = smov 0  }
   0x4   :  { %s1505_s14 = smov 0   ;;  %s1507_s15 = smov 0  }
   0x5 LB: > { %s1522_s16 = sadd.s32 4294967295, %s1473_s15   ;;  %s1121_s17 = sadd.s32 4294967294, %s1473_s15   ;;  %s1473_s15 = sphi %s1507_s15, %s2147_s15   ;;  %s1469_s14 = sphi %s1505_s14, %s2146_s14   ;;  %s1465_s13 = sphi %s1503_s13, %s2145_s13   ;;  %s1461_s12 = sphi %s1501_s12, %s2144_s12  }
   0x6   : > { %s1526_s18 = sadd.s32 1, %s1473_s15   ;;  %s93_s19 = sadd.s32 1, %s1469_s14 }
   0x7   : > { %s90_s20 = ssub.s32 %s1473_s15, %s1526_s18  ;;  %p103_p0 = scmp.ne.s32.totalorder %s1469_s14, %s1465_s13 }
   0x8   : > { %p91_p1 = scmp.eq.s32.totalorder %s90_s20, 0  ;;  %p104_p2 = scmp.eq.s32.totalorder %s1522_s16, 1 }
   0x9   : > { %p109_p3 = scmp.ne.s32.totalorder %s1465_s13, %s1461_s12  ;;  %p110_p4 = scmp.eq.s32.totalorder %s1121_s17, 1 }
   0xa   : > { %s1537_s21 = scalar_select %p91_p1, %s1469_s14, %s93_s19  }
   0xb   : > { %p1539_p5 = por %p104_p2, %p103_p0  ;;  %p1543_p6 = por %p110_p4, %p109_p3 }
   0xc   : > { %p1122_p7 = scmp.ge.s32.totalorder %s1473_s15, 1  ;;  %p117_p8 = scmp.lt.s32.totalorder %s1473_s15, 3 }
   0xd   : > { %s2133_s22 = scalar_select %p1539_p5, 1, 0 }
   0xe   : > { %s2134_s23 = scalar_select %p1543_p6, 1, 0 }
   0xf   : > { %p2130_p9 = scmp.eq.s32.totalorder %s1522_s16, 0  ;;  %p1550_p10 = pnand %p1122_p7, %p117_p8 }
  0x10   : > { %s130_s27 = sshll.u32 %s2126_s0, 4  ;;  %s141_s30 = sshll.u32 %s2127_s1, 4  ;;  %s131_s27 = int_to_ptr.vmem [resolvable:$true] %s130_s27  ;;  %s142_s30 = int_to_ptr.vmem [resolvable:$true] %s141_s30 }
  0x11   : > { %s2135_s24 = scalar_select %p1550_p10, 1, 0 }
  0x12   : > { %p1320_p11 = pneg %p1550_p10  ;;  %s1373_s5 = scalar_lea.vmem %s131_s27, 32 }
  0x13   : > { %p1374_p13 = scmp.ne.s32.totalorder %s131_s27, %s1373_s5  ;;  %p1381_p3 = scmp.lt.s32.totalorder %s131_s27, %s131_s27 }
  0x14   : > { %p1564_p12 = pnand %p2130_p9, %p1320_p11  ;;  %p1382_p4 = scmp.lt.s32.totalorder %s1373_s5, %s1373_s5 }
  0x16   : > { %p1375_p0 = pneg %p1564_p12  ;;  %p1383_p7 = por %p1382_p4, %p1381_p3 }
  0x18   : > { %p1376_p1 = pnand %p1375_p0, %p1374_p13 }
  0x1a   : > { %p1377_p2 = pneg %p1376_p1 }
  0x1c   : > { %p1384_p8 = pnand %p1383_p7, %p1377_p2 }
  0x1e   : > { %1387 = shalt.err (!%p1384_p8)
}
  0x1f   : > { %s1475_s6 = smov [#allocation2]   ;;  %s1388_s7 = scalar_lea.vmem %s142_s30, 16 }
  0x20   : > { %1323 = dma.vmem_to_smem (!%p1564_p12), %s131_s27, 32, %s1475_s6, [#allocation4]  }
  0x21   : > { %p1389_p11 = scmp.ne.s32.totalorder %s142_s30, %s1388_s7  ;;  %p1396_p5 = scmp.lt.s32.totalorder %s142_s30, %s142_s30 }
  0x22   : > { %p1397_p10 = scmp.lt.s32.totalorder %s1388_s7, %s1388_s7 }
  0x23   : > { %p1391_p9 = pnand %p1389_p11, %p1375_p0 }
  0x24   : > { %p1398_p13 = por %p1397_p10, %p1396_p5 }
  0x25   : > { %p1392_p6 = pneg %p1391_p9 }
  0x27   : > { %p1399_p1 = pnand %p1398_p13, %p1392_p6 }
  0x29   : > { %1402 = shalt.err (!%p1399_p1)
}
  0x2a   : > { %s1476_s8 = smov [#allocation5]   ;;  %p2137_p2 = scmp.ne.s32.totalorder %s2135_s24, 0 }
  0x2b   : > { %1326 = dma.vmem_to_smem (!%p1564_p12), %s142_s30, 16, %s1476_s8, [#allocation6]  }
  0x2c   : > { %162 = sbr.rel (%p2137_p2) target bundleno = 294 (0x126), region = 32  ;;  %p2138_p3 = scmp.eq.s32.totalorder (!%p2137_p2), %s1522_s16, 0 }
  0x33   : > { %1448 = dma.done.wait (%p2138_p3), [#allocation4], 32   ;;  %p2139_p4 = pmov %p2138_p3 }
  0x34   : > { %p2140_p9 = pmov %p2138_p3 }
  0x35   : > { %1450 = vsyncadd (%p2139_p4), [#allocation4], 4294967264 }
  0x36   : > { %1452 = dma.done.wait (%p2140_p9), [#allocation6], 16   ;;  %p2141_p5 = pmov %p2138_p3 }
  0x38   : > { %1454 = vsyncadd (%p2141_p5), [#allocation6], 4294967280 }
  0x39   : > { %172 = sfence }
  0x3a   : > { %p191_p6 = scmp.lt.s32.totalorder %s1522_s16, 1  ;;  %s1155_s9 = sld [smem:[#allocation2 + $0x4a]]  ;;  %vm1006_vm0 = vcmask 64512  }
  0x3b   : > { %s1137_s10 = sld [smem:[#allocation2 + $0x2]]  ;;  %s1164_s17 = sld [smem:[#allocation2 + $0x6e]] }
  0x3c   : > { %s192_s11 = scalar_select %p191_p6, %s1522_s16, 1 }
  0x3d   : > { %s1146_s19 = sld [smem:[#allocation2 + $0x26]]  ;;  %s1149_s24 = sld [smem:[#allocation2 + $0x29]] }
  0x3e   : > { %s1308_s20 = sshll.u32 %s192_s11, 8  ;;  %s1140_s28 = sld [smem:[#allocation2 + $0x5]] }
  0x3f   : > { %s1589_s27 = scalar_lea.vmem %s2128_s2, %s1308_s20  ;;  %s1167_s29 = sld [smem:[#allocation2 + $0x71]] }
  0x40   : > { %v1592_v0 = vld [vmem:[%s1589_s27] sm:$0xff]  ;;  %v310_v1 = vstv %s1155_s9  ;;  %s1158_s30 = sld [smem:[#allocation2 + $0x4d]]  ;;  %s1477_s4 = smov 127  }
  0x41   : > { %v214_v2 = vstv %s1137_s10  ;;  %v311_v3 = vmul.f32 %v310_v1, %v1592_v0  ;;  %v358_v5 = vstv %s1164_s17  ;;  %v1601_v9 = vld [vmem:[%s1589_s27 + $0x20] sm:$0xff]  ;;  %s1152_s5 = sld [smem:[#allocation2 + $0x2c]]  ;;  %s1143_s6 = sld [smem:[#allocation2 + $0x8]] }
  0x42   : > { %v215_v4 = vmul.f32 %v214_v2, %v1592_v0  ;;  %v359_v7 = vmul.f32 %v358_v5, %v1592_v0  ;;  %s1170_s7 = sld [smem:[#allocation2 + $0x74]]  ;;  %s1161_s8 = sld [smem:[#allocation2 + $0x50]]  ;;  %v1612_v18 = vld [vmem:[%s1589_s27 + $0x1] sm:$0xff] }
  0x43   : > { %v262_v6 = vstv %s1146_s19  ;;  %313 = vrot.lane.b32.xlu1 %v311_v3, %s1477_s4  ;;  %v278_v10 = vstv %s1149_s24  ;;  %s1188_s9 = sld [smem:[#allocation2 + $0x2f]]  ;;  %s1179_s10 = sld [smem:[#allocation2 + $0xb]]  ;;  %v1623_v27 = vld [vmem:[%s1589_s27 + $0x40] sm:$0xff] }
  0x44   : > { %217 = vrot.lane.b32.xlu0 %v215_v4, %s1477_s4  ;;  %v263_v8 = vmul.f32 %v262_v6, %v1592_v0  ;;  %v230_v11 = vstv %s1140_s28  ;;  %v279_v12 = vmul.f32 %v1601_v9, %v278_v10  ;;  %s1206_s11 = sld [smem:[#allocation2 + $0x77]]  ;;  %s1197_s17 = sld [smem:[#allocation2 + $0x53]]  ;;  %v1634_v36 = vld [vmem:[%s1589_s27 + $0x60] sm:$0xff] }
  0x45   : > { %v231_v13 = vmul.f32 %v1601_v9, %v230_v11  ;;  %v374_v14 = vstv %s1167_s29  ;;  %s1191_s19 = sld [smem:[#allocation2 + $0x32]]  ;;  %s1182_s20 = sld [smem:[#allocation2 + $0xe]]  ;;  %v1645_v45 = vld [vmem:[%s1589_s27 + $0x41] sm:$0xff] }
  0x46   : > { %v326_v15 = vstv %s1158_s30  ;;  %v375_v16 = vmul.f32 %v1601_v9, %v374_v14  ;;  %s1209_s24 = sld [smem:[#allocation2 + $0x7a]]  ;;  %s1200_s25 = sld [smem:[#allocation2 + $0x56]]  ;;  %v1656_v54 = vld [vmem:[%s1589_s27 + $0x80] sm:$0xff] }
  0x47   : > { %361 = vrot.lane.b32.xlu1 %v359_v7, %s1477_s4  ;;  %v327_v17 = vmul.f32 %v1601_v9, %v326_v15  ;;  %v294_v19 = vstv %s1152_s5  ;;  %v246_v20 = vstv %s1143_s6  ;;  %s1194_s26 = sld [smem:[#allocation2 + $0x35]]  ;;  %s1185_s28 = sld [smem:[#allocation2 + $0x11]]  ;;  %v1667_v63 = vld [vmem:[%s1589_s27 + $0xa0] sm:$0xff] }
  0x48   : > { %265 = vrot.lane.b32.xlu0 %v263_v8, %s1477_s4  ;;  %v295_v21 = vmul.f32 %v294_v19, %v1612_v18  ;;  %v247_v22 = vmul.f32 %v246_v20, %v1612_v18  ;;  %v390_v23 = vstv %s1170_s7  ;;  %v342_v24 = vstv %s1161_s8  ;;  %s1212_s29 = sld [smem:[#allocation2 + $0x7d]]  ;;  %s1203_s30 = sld [smem:[#allocation2 + $0x59]]  ;;  %v1678_v10 = vld [vmem:[%s1589_s27 + $0x81] sm:$0xff] }
  0x49   : > { %v391_v25 = vmul.f32 %v390_v23, %v1612_v18  ;;  %v343_v26 = vmul.f32 %v342_v24, %v1612_v18  ;;  %v464_v28 = vstv %s1188_s9  ;;  %v416_v29 = vstv %s1179_s10  ;;  %s1230_s5 = sld [smem:[#allocation2 + $0x38]]  ;;  %s1221_s6 = sld [smem:[#allocation2 + $0x14]]  ;;  %v1689_v20 = vld [vmem:[%s1589_s27 + $0xc0] sm:$0xff] }
  0x4a   : > { %v465_v30 = vmul.f32 %v1623_v27, %v464_v28  ;;  %v417_v31 = vmul.f32 %v1623_v27, %v416_v29  ;;  %v560_v32 = vstv %s1206_s11  ;;  %v512_v33 = vstv %s1197_s17  ;;  %s1248_s7 = sld [smem:[#allocation2 + $0x80]]  ;;  %s1239_s8 = sld [smem:[#allocation2 + $0x5c]] }
  0x4b   : > { %281 = vrot.lane.b32.xlu1 %v279_v12, %s1477_s4  ;;  %v561_v34 = vmul.f32 %v1623_v27, %v560_v32  ;;  %v513_v35 = vmul.f32 %v1623_v27, %v512_v33  ;;  %v480_v37 = vstv %s1191_s19  ;;  %v432_v38 = vstv %s1182_s20  ;;  %s1233_s9 = sld [smem:[#allocation2 + $0x3b]]  ;;  %s1224_s10 = sld [smem:[#allocation2 + $0x17]] }
  0x4c   : > { %233 = vrot.lane.b32.xlu0 %v231_v13, %s1477_s4  ;;  %v481_v39 = vmul.f32 %v1634_v36, %v480_v37  ;;  %v433_v40 = vmul.f32 %v1634_v36, %v432_v38  ;;  %v576_v41 = vstv %s1209_s24  ;;  %v528_v42 = vstv %s1200_s25  ;;  %s1251_s11 = sld [smem:[#allocation2 + $0x83]]  ;;  %s1242_s17 = sld [smem:[#allocation2 + $0x5f]] }
  0x4d   : > { %v577_v43 = vmul.f32 %v1634_v36, %v576_v41  ;;  %v529_v44 = vmul.f32 %v1634_v36, %v528_v42  ;;  %v496_v46 = vstv %s1194_s26  ;;  %v448_v47 = vstv %s1185_s28  ;;  %s1236_s19 = sld [smem:[#allocation2 + $0x3e]]  ;;  %s1227_s20 = sld [smem:[#allocation2 + $0x1a]] }
  0x4e   : > { %v497_v48 = vmul.f32 %v1645_v45, %v496_v46  ;;  %v449_v49 = vmul.f32 %v1645_v45, %v448_v47  ;;  %v592_v50 = vstv %s1212_s29  ;;  %v544_v51 = vstv %s1203_s30  ;;  %s1254_s24 = sld [smem:[#allocation2 + $0x86]]  ;;  %s1245_s25 = sld [smem:[#allocation2 + $0x62]] }
  0x4f   : > { %377 = vrot.lane.b32.xlu1 %v375_v16, %s1477_s4  ;;  %v593_v52 = vmul.f32 %v1645_v45, %v592_v50  ;;  %v545_v53 = vmul.f32 %v1645_v45, %v544_v51  ;;  %v666_v55 = vstv %s1230_s5  ;;  %v618_v56 = vstv %s1221_s6  ;;  %s1272_s26 = sld [smem:[#allocation2 + $0x41]]  ;;  %s1263_s28 = sld [smem:[#allocation2 + $0x1d]]  ;;  %v1132_v50 = vld [vmem:[%s1589_s27 + $0x10] sm:$0xff] }
  0x50   : > { %329 = vrot.lane.b32.xlu0 %v327_v17, %s1477_s4  ;;  %v667_v57 = vmul.f32 %v1656_v54, %v666_v55  ;;  %v619_v58 = vmul.f32 %v1656_v54, %v618_v56  ;;  %v762_v59 = vstv %s1248_s7  ;;  %v714_v60 = vstv %s1239_s8  ;;  %s1290_s29 = sld [smem:[#allocation2 + $0x89]]  ;;  %s1281_s30 = sld [smem:[#allocation2 + $0x65]] }
  0x51   : > { %v763_v61 = vmul.f32 %v1656_v54, %v762_v59  ;;  %v715_v62 = vmul.f32 %v1656_v54, %v714_v60  ;;  %v682_v1 = vstv %s1233_s9  ;;  %v634_v2 = vstv %s1224_s10  ;;  %s1275_s5 = sld [smem:[#allocation2 + $0x44]]  ;;  %s1266_s6 = sld [smem:[#allocation2 + $0x20]] }
  0x52   : > { %v683_v3 = vmul.f32 %v1667_v63, %v682_v1  ;;  %v635_v4 = vmul.f32 %v1667_v63, %v634_v2  ;;  %v778_v5 = vstv %s1251_s11  ;;  %v730_v6 = vstv %s1242_s17  ;;  %s1293_s7 = sld [smem:[#allocation2 + $0x8c]]  ;;  %s1284_s8 = sld [smem:[#allocation2 + $0x68]] }
  0x53   : > { %297 = vrot.lane.b32.xlu1 %v295_v21, %s1477_s4  ;;  %v779_v7 = vmul.f32 %v1667_v63, %v778_v5  ;;  %v731_v8 = vmul.f32 %v1667_v63, %v730_v6  ;;  %v698_v11 = vstv %s1236_s19  ;;  %v650_v12 = vstv %s1227_s20  ;;  %s1278_s9 = sld [smem:[#allocation2 + $0x47]]  ;;  %s1269_s10 = sld [smem:[#allocation2 + $0x23]] }
  0x54   : > { %249 = vrot.lane.b32.xlu0 %v247_v22, %s1477_s4  ;;  %v699_v13 = vmul.f32 %v1678_v10, %v698_v11  ;;  %v651_v14 = vmul.f32 %v1678_v10, %v650_v12  ;;  %v794_v15 = vstv %s1254_s24  ;;  %v746_v16 = vstv %s1245_s25  ;;  %s1296_s11 = sld [smem:[#allocation2 + $0x8f]]  ;;  %s1287_s17 = sld [smem:[#allocation2 + $0x6b]] }
  0x55   : > { %v795_v17 = vmul.f32 %v1678_v10, %v794_v15  ;;  %v747_v19 = vmul.f32 %v1678_v10, %v746_v16  ;;  %v868_v21 = vstv %s1272_s26  ;;  %v820_v22 = vstv %s1263_s28  ;;  %s1153_s19 = sld [smem:[#allocation2 + $0x48]]  ;;  %s1154_s20 = sld [smem:[#allocation2 + $0x49]]  ;;  %v1134_v16 = vld [vmem:[%s1589_s27 + $0x30] sm:$0xff] }
  0x56   : > { %v869_v23 = vmul.f32 %v1689_v20, %v868_v21  ;;  %v821_v24 = vmul.f32 %v1689_v20, %v820_v22  ;;  %s205_s24 = sld [smem:[#allocation2]]  ;;  %s1136_s25 = sld [smem:[#allocation2 + $0x1]] }
  0x57   : > { %393 = vrot.lane.b32.xlu1 %v391_v25, %s1477_s4  ;;  %v964_v25 = vstv %s1290_s29  ;;  %v836_v32 = vstv %s1266_s6  ;;  %s1162_s26 = sld [smem:[#allocation2 + $0x6c]]  ;;  %s1723_s28 = sld [smem:[#allocation2 + $0x6d]] }
  0x58   : > { %345 = vrot.lane.b32.xlu0 %v343_v26, %s1477_s4  ;;  %v916_v26 = vstv %s1281_s30  ;;  %v965_v28 = vmul.f32 %v1689_v20, %v964_v25  ;;  %v932_v37 = vstv %s1284_s8  ;;  %s1725_s29 = sld [smem:[#allocation2 + $0x24]]  ;;  %s1727_s30 = sld [smem:[#allocation2 + $0x25]] }
  0x59   : > { %v917_v29 = vmul.f32 %v1689_v20, %v916_v26  ;;  %v900_v41 = vstv %s1278_s9  ;;  %v852_v42 = vstv %s1269_s10  ;;  %s1731_s6 = sld [smem:[#allocation2 + $0x3]]  ;;  %s1738_s8 = sld [smem:[#allocation2 + $0x4]] }
  0x5a   : > { %v996_v46 = vstv %s1296_s11  ;;  %v948_v47 = vstv %s1287_s17  ;;  %s1741_s9 = sld [smem:[#allocation2 + $0x28]]  ;;  %s1747_s10 = sld [smem:[#allocation2 + $0x6]] }
  0x5b   : > { %467 = vrot.lane.b32.xlu1 %v465_v30, %s1477_s4  ;;  %v1700_v30 = vld [vmem:[%s1589_s27 + $0xe0] sm:$0xff]  ;;  %v302_v51 = vstv %s1153_s19  ;;  %s1750_s11 = sld [smem:[#allocation2 + $0x70]]  ;;  %s1752_s17 = sld [smem:[#allocation2 + $0x4c]] }
  0x5c   : > { %419 = vrot.lane.b32.xlu0 %v417_v31, %s1477_s4  ;;  %v884_v31 = vstv %s1275_s5  ;;  %s1729_s5 = sld [smem:[#allocation2 + $0x4b]]  ;;  %v210_v55 = vstv %s1136_s25  ;;  %s1756_s19 = sld [smem:[#allocation2 + $0x2a]] }
  0x5d   : > { %v885_v33 = vmul.f32 %v1700_v30, %v884_v31  ;;  %v350_v60 = vstv %s1162_s26  ;;  %s1764_s25 = sld [smem:[#allocation2 + $0x2b]]  ;;  %s1771_s26 = sld [smem:[#allocation2 + $0x7]] }
  0x5e   : > { %v258_v1 = vstv %s1727_s30  ;;  %v351_v5 = vmul.f32 %v350_v60, %v1592_v0  ;;  %s1781_s30 = sld [smem:[#allocation2 + $0x73]]  ;;  %p2142_p12 = scmp.ne.s32.totalorder %s2133_s22, 0 }
  0x5f   : > { %563 = vrot.lane.b32.xlu1 %v561_v34, %s1477_s4  ;;  %v837_v34 = vmul.f32 %v1700_v30, %v836_v32  ;;  %v259_v11 = vmul.f32 %v1132_v50, %v258_v1 }
  0x60   : > { %515 = vrot.lane.b32.xlu0 %v513_v35, %s1477_s4  ;;  %v980_v35 = vstv %s1293_s7  ;;  %s1736_s7 = sld [smem:[#allocation2 + $0x27]]  ;;  %v274_v21 = vstv %s1741_s9  ;;  %v238_v31 = vstv %s1747_s10  ;;  %s1807_s9 = sld [smem:[#allocation2 + $0x30]] }
  0x61   : > { %v981_v38 = vmul.f32 %v1700_v30, %v980_v35  ;;  %v322_v35 = vstv %s1752_s17  ;;  %s1809_s10 = sld [smem:[#allocation2 + $0xc]]  ;;  %s1815_s17 = sld [smem:[#allocation2 + $0x52]] }
  0x62   : > { %v318_v2 = vstv %s1729_s5  ;;  %s1783_s5 = sld [smem:[#allocation2 + $0x4f]] }
  0x63   : > { %483 = vrot.lane.b32.xlu1 %v481_v39, %s1477_s4  ;;  %v933_v39 = vmul.f32 %v1700_v30, %v932_v37  ;;  %v319_v12 = vmul.f32 %v1601_v9, %v318_v2 }
  0x64   : > { %435 = vrot.lane.b32.xlu0 %v433_v40, %s1477_s4  ;;  %v1711_v40 = vld [vmem:[%s1589_s27 + $0xc1] sm:$0xff] }
  0x66   : > { %v270_v15 = vstv %s1736_s7  ;;  %s1796_s7 = sld [smem:[#allocation2 + $0x2e]] }
  0x67   : > { %579 = vrot.lane.b32.xlu1 %v577_v43, %s1477_s4  ;;  %v901_v43 = vmul.f32 %v1711_v40, %v900_v41  ;;  %v286_v41 = vstv %s1756_s19  ;;  %s1821_s19 = sld [smem:[#allocation2 + $0x78]] }
  0x68   : > { %531 = vrot.lane.b32.xlu0 %v529_v44, %s1477_s4  ;;  %v853_v44 = vmul.f32 %v1711_v40, %v852_v42 }
  0x6b   : > { %499 = vrot.lane.b32.xlu1 %v497_v48, %s1477_s4  ;;  %v997_v48 = vmul.f32 %v1711_v40, %v996_v46  ;;  %v239_v46 = vmul.f32 %v238_v31, %v1612_v18 }
  0x6c   : > { %451 = vrot.lane.b32.xlu0 %v449_v49, %s1477_s4  ;;  %v949_v49 = vmul.f32 %v1711_v40, %v948_v47 }
  0x6f   : > { %595 = vrot.lane.b32.xlu1 %v593_v52, %s1477_s4  ;;  %v306_v52 = vstv %s1154_s20  ;;  %s1759_s20 = sld [smem:[#allocation2 + $0x72]] }
  0x70   : > { %547 = vrot.lane.b32.xlu0 %v545_v53, %s1477_s4  ;;  %v206_v53 = vstv %s205_s24  ;;  %v307_v56 = vmul.f32 %v1132_v50, %v306_v52  ;;  %s1761_s24 = sld [smem:[#allocation2 + $0x4e]] }
  0x71   : > { %v207_v59 = vmul.f32 %v206_v53, %v1592_v0  ;;  %v1135_v53 = vld [vmem:[%s1589_s27 + $0x11] sm:$0xff] }
  0x73   : > { %669 = vrot.lane.b32.xlu1 %v667_v57, %s1477_s4  ;;  %v303_v57 = vmul.f32 %v302_v51, %v1592_v0 }
  0x74   : > { %621 = vrot.lane.b32.xlu0 %v619_v58, %s1477_s4  ;;  %v211_v58 = vmul.f32 %v1132_v50, %v210_v55  ;;  %v242_v55 = vstv %s1771_s26  ;;  %s1836_s26 = sld [smem:[#allocation2 + $0x33]] }
  0x76   : > { %v212_v6 = vadd.f32 %v211_v58, %v207_v59 }
  0x77   : > { %765 = vrot.lane.b32.xlu1 %v763_v61, %s1477_s4  ;;  %v354_v61 = vstv %s1723_s28  ;;  %s1774_s28 = sld [smem:[#allocation2 + $0x2d]] }
  0x78   : > { %717 = vrot.lane.b32.xlu0 %v715_v62, %s1477_s4  ;;  %v254_v62 = vstv %s1725_s29  ;;  %s1776_s29 = sld [smem:[#allocation2 + $0x9]] }
  0x7b   : > { %685 = vrot.lane.b32.xlu1 %v683_v3, %s1477_s4  ;;  %v308_v3 = vadd.f32 %v307_v56, %v303_v57  ;;  %v287_v56 = vmul.f32 %v286_v41, %v1612_v18  ;;  %v472_v41 = vstv %s1807_s9  ;;  %s1867_s9 = sld [smem:[#allocation2 + $0x12]] }
  0x7c   : > { %637 = vrot.lane.b32.xlu0 %v635_v4, %s1477_s4  ;;  %v222_v4 = vstv %s1731_s6  ;;  %s1788_s6 = sld [smem:[#allocation2 + $0x75]] }
  0x7d   : > { %v456_v1 = vstv %s1774_s28  ;;  %s1838_s28 = sld [smem:[#allocation2 + $0xf]] }
  0x7e   : > { %v408_v2 = vstv %s1776_s29  ;;  %s1842_s29 = sld [smem:[#allocation2 + $0x79]] }
  0x7f   : > { %781 = vrot.lane.b32.xlu1 %v779_v7, %s1477_s4  ;;  %v355_v7 = vmul.f32 %v1132_v50, %v354_v61 }
  0x80   : > { %733 = vrot.lane.b32.xlu0 %v731_v8, %s1477_s4  ;;  %v255_v8 = vmul.f32 %v254_v62, %v1592_v0 }
  0x82   : > { %v260_v25 = vadd.f32 %v259_v11, %v255_v8 }
  0x83   : > { %701 = vrot.lane.b32.xlu1 %v699_v13, %s1477_s4  ;;  %v223_v13 = vmul.f32 %v1601_v9, %v222_v4  ;;  %v243_v4 = vmul.f32 %v1135_v53, %v242_v55 }
  0x84   : > { %653 = vrot.lane.b32.xlu0 %v651_v14, %s1477_s4 }
  0x87   : > { %797 = vrot.lane.b32.xlu1 %v795_v17, %s1477_s4  ;;  %v226_v17 = vstv %s1738_s8  ;;  %s1798_s8 = sld [smem:[#allocation2 + $0xa]] }
  0x88   : > { %749 = vrot.lane.b32.xlu0 %v747_v19, %s1477_s4 }
  0x8b   : > { %871 = vrot.lane.b32.xlu1 %v869_v23, %s1477_s4 }
  0x8c   : > { %823 = vrot.lane.b32.xlu0 %v821_v24, %s1477_s4  ;;  %v356_v24 = vadd.f32 %v355_v7, %v351_v5  ;;  %v386_v5 = vstv %s1781_s30  ;;  %s1844_s30 = sld [smem:[#allocation2 + $0x55]] }
  0x8f   : > { %967 = vrot.lane.b32.xlu1 %v965_v28, %s1477_s4  ;;  %v271_v28 = vmul.f32 %v1601_v9, %v270_v15  ;;  %v409_v15 = vmul.f32 %v1623_v27, %v408_v2 }
  0x90   : > { %919 = vrot.lane.b32.xlu0 %v917_v29, %s1477_s4  ;;  %v227_v29 = vmul.f32 %v1134_v16, %v226_v17 }
  0x93   : > { %887 = vrot.lane.b32.xlu1 %v885_v33, %s1477_s4 }
  0x94   : > { %839 = vrot.lane.b32.xlu0 %v837_v34, %s1477_s4  ;;  %v370_v34 = vstv %s1750_s11  ;;  %s1813_s11 = sld [smem:[#allocation2 + $0x76]] }
  0x95   : > { %v371_v47 = vmul.f32 %v1134_v16, %v370_v34 }
  0x97   : > { %983 = vrot.lane.b32.xlu1 %v981_v38, %s1477_s4 }
  0x98   : > { %935 = vrot.lane.b32.xlu0 %v933_v39, %s1477_s4  ;;  %v275_v39 = vmul.f32 %v1134_v16, %v274_v21 }
  0x9b   : > { %903 = vrot.lane.b32.xlu1 %v901_v43, %s1477_s4  ;;  %v382_v43 = vstv %s1759_s20  ;;  %s1823_s20 = sld [smem:[#allocation2 + $0x54]] }
  0x9c   : > { %855 = vrot.lane.b32.xlu0 %v853_v44, %s1477_s4  ;;  %v334_v44 = vstv %s1761_s24  ;;  %v383_v59 = vmul.f32 %v382_v43, %v1612_v18  ;;  %s1827_s24 = sld [smem:[#allocation2 + $0x31]] }
  0x9d   : > { %v335_v60 = vmul.f32 %v334_v44, %v1612_v18  ;;  %v556_v44 = vstv %s1813_s11  ;;  %s1873_s11 = sld [smem:[#allocation2 + $0x58]] }
  0x9f   : > { %999 = vrot.lane.b32.xlu1 %v997_v48, %s1477_s4  ;;  %v323_v48 = vmul.f32 %v1134_v16, %v322_v35  ;;  %v552_v16 = vstv %s1788_s6  ;;  %s1852_s6 = sld [smem:[#allocation2 + $0x57]] }
  0xa0   : > { %951 = vrot.lane.b32.xlu0 %v949_v49, %s1477_s4  ;;  %s1734_s4 = sld [smem:[#allocation2 + $0x6f]]  ;;  %v290_v49 = vstv %s1764_s25  ;;  %s1829_s25 = sld [smem:[#allocation2 + $0xd]]  ;;  %v553_v35 = vmul.f32 %v1623_v27, %v552_v16 }
  0xa6   : > { %v366_v14 = vstv %s1734_s4  ;;  %s1792_s4 = sld [smem:[#allocation2 + $0x51]] }
  0xa7   : > { %v367_v26 = vmul.f32 %v1601_v9, %v366_v14  ;;  %v457_v14 = vmul.f32 %v1623_v27, %v456_v1 }
  0xac   : > { %v504_v21 = vstv %s1792_s4  ;;  %s1856_s4 = sld [smem:[#allocation2 + $0x34]] }
  0xb5   : > { %v314_v19 = vpop.permute.xlu1 %313 }
  0xb6   : > { %v218_v0 = vpop.permute.xlu0 %217  ;;  %v316_v22 = vadd.f32 %v314_v19, %v308_v3  ;;  %v291_v3 = vmul.f32 %v1135_v53, %v290_v49 }
  0xb7   : > { %v220_v23 = vadd.f32 %v218_v0, %v212_v6  ;;  %v338_v6 = vstv %s1783_s5  ;;  %s1850_s5 = sld [smem:[#allocation2 + $0x7b]] }
  0xb8   : > { %v320_v32 = vadd.f32 %v319_v12, %v316_v22  ;;  %v387_v22 = vmul.f32 %v1135_v53, %v386_v5  ;;  %v1174_v5 = vld [vmem:[%s1589_s27 + $0x70] sm:$0xff] }
  0xb9   : > { %v224_v33 = vadd.f32 %v223_v13, %v220_v23  ;;  %v362_v37 = vpop.permute.xlu1 %361  ;;  %v339_v23 = vmul.f32 %v1135_v53, %v338_v6 }
  0xba   : > { %v266_v38 = vpop.permute.xlu0 %265  ;;  %v364_v9 = vadd.f32 %v362_v37, %v356_v24  ;;  %v324_v11 = vadd.f32 %v323_v48, %v320_v32  ;;  %v460_v24 = vstv %s1796_s7  ;;  %v1172_v32 = vld [vmem:[%s1589_s27 + $0x50] sm:$0xff]  ;;  %v505_v37 = vmul.f32 %v1623_v27, %v504_v21  ;;  %s1858_s7 = sld [smem:[#allocation2 + $0x10]] }
  0xbb   : > { %v268_v42 = vadd.f32 %v266_v38, %v260_v25  ;;  %v228_v52 = vadd.f32 %v227_v29, %v224_v33  ;;  %v412_v25 = vstv %s1798_s8  ;;  %s1865_s8 = sld [smem:[#allocation2 + $0x36]] }
  0xbc   : > { %v368_v50 = vadd.f32 %v367_v26, %v364_v9  ;;  %v424_v9 = vstv %s1809_s10  ;;  %v413_v43 = vmul.f32 %v1172_v32, %v412_v25  ;;  %s1871_s10 = sld [smem:[#allocation2 + $0x7c]] }
  0xbd   : > { %v272_v51 = vadd.f32 %v271_v28, %v268_v42  ;;  %v282_v57 = vpop.permute.xlu1 %281  ;;  %v461_v42 = vmul.f32 %v1172_v32, %v460_v24  ;;  %v425_v53 = vmul.f32 %v1634_v36, %v424_v9 }
  0xbe   : > { %v234_v58 = vpop.permute.xlu0 %233  ;;  %v372_v8 = vadd.f32 %v371_v47, %v368_v50 }
  0xbf   : > { %v276_v61 = vadd.f32 %v275_v39, %v272_v51  ;;  %v236_v62 = vadd.f32 %v234_v58, %v228_v52  ;;  %v473_v52 = vmul.f32 %v1634_v36, %v472_v41  ;;  %v520_v58 = vstv %s1823_s20  ;;  %s1885_s20 = sld [smem:[#allocation2 + $0x37]] }
  0xc1   : > { %v284_v7 = vadd.f32 %v282_v57, %v276_v61  ;;  %v240_v18 = vadd.f32 %v239_v46, %v236_v62  ;;  %v378_v12 = vpop.permute.xlu1 %377  ;;  %v508_v46 = vstv %s1815_s17  ;;  %v568_v57 = vstv %s1821_s19  ;;  %s1879_s17 = sld [smem:[#allocation2 + $0x7e]]  ;;  %s1881_s19 = sld [smem:[#allocation2 + $0x5a]] }
  0xc2   : > { %v330_v13 = vpop.permute.xlu0 %329  ;;  %v380_v19 = vadd.f32 %v378_v12, %v372_v8  ;;  %v476_v61 = vstv %s1827_s24  ;;  %v428_v62 = vstv %s1829_s25  ;;  %v521_v8 = vmul.f32 %v1634_v36, %v520_v58  ;;  %s1887_s24 = sld [smem:[#allocation2 + $0x13]]  ;;  %s1894_s25 = sld [smem:[#allocation2 + $0x39]] }
  0xc3   : > { %v288_v17 = vadd.f32 %v287_v56, %v284_v7  ;;  %v332_v0 = vadd.f32 %v330_v13, %v324_v11  ;;  %v244_v31 = vadd.f32 %v243_v4, %v240_v18  ;;  %v569_v18 = vmul.f32 %v1634_v36, %v568_v57 }
  0xc4   : > { %v384_v26 = vadd.f32 %v383_v59, %v380_v19  ;;  %v557_v59 = vmul.f32 %v1172_v32, %v556_v44  ;;  %v488_v13 = vstv %s1836_s26  ;;  %v429_v16 = vmul.f32 %v1174_v5, %v428_v62  ;;  %s1896_s26 = sld [smem:[#allocation2 + $0x15]] }
  0xc5   : > { %v336_v28 = vadd.f32 %v335_v60, %v332_v0  ;;  %v292_v29 = vadd.f32 %v291_v3, %v288_v17  ;;  %v298_v33 = vpop.permute.xlu1 %297  ;;  %v509_v60 = vmul.f32 %v1172_v32, %v508_v46  ;;  %v572_v17 = vstv %s1842_s29  ;;  %s1902_s29 = sld [smem:[#allocation2 + $0x5b]] }
  0xc6   : > { %v250_v34 = vpop.permute.xlu0 %249  ;;  %v388_v48 = vadd.f32 %v387_v22, %v384_v26  ;;  %v524_v19 = vstv %s1844_s30  ;;  %v489_v25 = vmul.f32 %v1645_v45, %v488_v13  ;;  %v536_v32 = vstv %s1852_s6  ;;  %s1908_s30 = sld [smem:[#allocation2 + $0x81]]  ;;  %s1914_s6 = sld [smem:[#allocation2 + $0x3a]] }
  0xc7   : > { %v300_v38 = vadd.f32 %v298_v33, %v292_v29  ;;  %v252_v39 = vadd.f32 %v250_v34, %v244_v31  ;;  %v340_v49 = vadd.f32 %v339_v23, %v336_v28  ;;  %v584_v31 = vstv %s1850_s5  ;;  %s1910_s5 = sld [smem:[#allocation2 + $0x5d]] }
  0xc8   : > { %v573_v33 = vmul.f32 %v1174_v5, %v572_v17  ;;  %v525_v34 = vmul.f32 %v1174_v5, %v524_v19  ;;  %v585_v46 = vmul.f32 %v1645_v45, %v584_v31 }
  0xc9   : > { %v458_v47 = vadd.f32 %v457_v14, %v300_v38  ;;  %v410_v27 = vadd.f32 %v409_v15, %v252_v39  ;;  %v394_v50 = vpop.permute.xlu1 %393  ;;  %v440_v14 = vstv %s1838_s28  ;;  %v477_v15 = vmul.f32 %v1174_v5, %v476_v61  ;;  %s1900_s28 = sld [smem:[#allocation2 + $0x7f]] }
  0xca   : > { %v346_v51 = vpop.permute.xlu0 %345  ;;  %v396_v55 = vadd.f32 %v394_v50, %v388_v48  ;;  %v441_v26 = vmul.f32 %v1645_v45, %v440_v14  ;;  %v610_v50 = vstv %s1867_s9  ;;  %v1214_v14 = vld [vmem:[%s1589_s27 + $0x90] sm:$0xff]  ;;  %s1929_s9 = sld [smem:[#allocation2 + $0x82]] }
  0xcb   : > { %v348_v56 = vadd.f32 %v346_v51, %v340_v49  ;;  %v462_v3 = vadd.f32 %v461_v42, %v458_v47  ;;  %v414_v4 = vadd.f32 %v413_v43, %v410_v27  ;;  %v1176_v42 = vld [vmem:[%s1589_s27 + $0x51] sm:$0xff]  ;;  %v537_v47 = vmul.f32 %v1645_v45, %v536_v32 }
  0xcc   : > { %v554_v1 = vadd.f32 %v553_v35, %v396_v55  ;;  %v492_v35 = vstv %s1856_s4  ;;  %v658_v49 = vstv %s1865_s8  ;;  %v540_v55 = vstv %s1873_s11  ;;  %s1916_s4 = sld [smem:[#allocation2 + $0x16]]  ;;  %s1925_s8 = sld [smem:[#allocation2 + $0x18]] }
  0xcd   : > { %v506_v2 = vadd.f32 %v505_v37, %v348_v56  ;;  %v468_v6 = vpop.permute.xlu1 %467  ;;  %v444_v37 = vstv %s1858_s7  ;;  %v493_v51 = vmul.f32 %v1176_v42, %v492_v35  ;;  %v659_v61 = vmul.f32 %v1656_v54, %v658_v49  ;;  %s1923_s7 = sld [smem:[#allocation2 + $0x3c]]  ;;  %v1216_v49 = vld [vmem:[%s1589_s27 + $0xb0] sm:$0xff] }
  0xce   : > { %v420_v7 = vpop.permute.xlu0 %419  ;;  %v470_v11 = vadd.f32 %v468_v6, %v462_v3  ;;  %v558_v21 = vadd.f32 %v557_v59, %v554_v1  ;;  %v611_v62 = vmul.f32 %v1656_v54, %v610_v50  ;;  %v754_v3 = vstv %s1879_s17  ;;  %s1937_s11 = sld [smem:[#allocation2 + $0x84]]  ;;  %s1939_s17 = sld [smem:[#allocation2 + $0x60]] }
  0xcf   : > { %v422_v12 = vadd.f32 %v420_v7, %v414_v4  ;;  %v510_v22 = vadd.f32 %v509_v60, %v506_v2  ;;  %v706_v4 = vstv %s1881_s19  ;;  %v541_v6 = vmul.f32 %v1176_v42, %v540_v55  ;;  %s1943_s19 = sld [smem:[#allocation2 + $0x3d]] }
  0xd0   : > { %v474_v0 = vadd.f32 %v473_v52, %v470_v11  ;;  %v445_v52 = vmul.f32 %v1176_v42, %v444_v37  ;;  %v662_v7 = vstv %s1885_s20  ;;  %v755_v17 = vmul.f32 %v1656_v54, %v754_v3  ;;  %s1945_s20 = sld [smem:[#allocation2 + $0x19]] }
  0xd1   : > { %v426_v36 = vadd.f32 %v425_v53, %v422_v12  ;;  %v564_v23 = vpop.permute.xlu1 %563  ;;  %v588_v53 = vstv %s1871_s10  ;;  %v707_v19 = vmul.f32 %v1656_v54, %v706_v4  ;;  %s1931_s10 = sld [smem:[#allocation2 + $0x5e]] }
  0xd2   : > { %v516_v24 = vpop.permute.xlu0 %515  ;;  %v566_v28 = vadd.f32 %v564_v23, %v558_v21  ;;  %v478_v41 = vadd.f32 %v477_v15, %v474_v0  ;;  %v589_v5 = vmul.f32 %v1176_v42, %v588_v53  ;;  %v674_v21 = vstv %s1894_s25  ;;  %s1954_s25 = sld [smem:[#allocation2 + $0x1b]] }
  0xd3   : > { %v518_v29 = vadd.f32 %v516_v24, %v510_v22  ;;  %v430_v9 = vadd.f32 %v429_v16, %v426_v36  ;;  %v626_v22 = vstv %s1896_s26  ;;  %v663_v23 = vmul.f32 %v1214_v14, %v662_v7  ;;  %s1958_s26 = sld [smem:[#allocation2 + $0x85]] }
  0xd4   : > { %v570_v38 = vadd.f32 %v569_v18, %v566_v28  ;;  %v614_v18 = vstv %s1887_s24  ;;  %v627_v35 = vmul.f32 %v1667_v63, %v626_v22  ;;  %s1952_s24 = sld [smem:[#allocation2 + $0x3f]] }
  0xd5   : > { %v522_v39 = vadd.f32 %v521_v8, %v518_v29  ;;  %v484_v43 = vpop.permute.xlu1 %483  ;;  %v615_v24 = vmul.f32 %v1214_v14, %v614_v18 }
  0xd6   : > { %v436_v44 = vpop.permute.xlu0 %435  ;;  %v486_v27 = vadd.f32 %v484_v43, %v478_v41  ;;  %v574_v57 = vadd.f32 %v573_v33, %v570_v38  ;;  %v722_v41 = vstv %s1910_s5  ;;  %v678_v43 = vstv %s1914_s6  ;;  %s1972_s5 = sld [smem:[#allocation2 + $0x40]]  ;;  %s1974_s6 = sld [smem:[#allocation2 + $0x1c]] }
  0xd7   : > { %v438_v48 = vadd.f32 %v436_v44, %v430_v9  ;;  %v526_v58 = vadd.f32 %v525_v34, %v522_v39  ;;  %v675_v34 = vmul.f32 %v1667_v63, %v674_v21  ;;  %v770_v39 = vstv %s1908_s30  ;;  %s1968_s30 = sld [smem:[#allocation2 + $0x63]] }
  0xd8   : > { %v490_v56 = vadd.f32 %v489_v25, %v486_v27  ;;  %v758_v25 = vstv %s1900_s28  ;;  %v630_v44 = vstv %s1916_s4  ;;  %v723_v53 = vmul.f32 %v1667_v63, %v722_v41  ;;  %s1960_s28 = sld [smem:[#allocation2 + $0x61]]  ;;  %s1981_s4 = sld [smem:[#allocation2 + $0x42]] }
  0xd9   : > { %v442_v45 = vadd.f32 %v441_v26, %v438_v48  ;;  %v580_v59 = vpop.permute.xlu1 %579  ;;  %v710_v26 = vstv %s1902_s29  ;;  %v759_v9 = vmul.f32 %v1214_v14, %v758_v25  ;;  %s1966_s29 = sld [smem:[#allocation2 + $0x87]] }
  0xda   : > { %v532_v60 = vpop.permute.xlu0 %531  ;;  %v582_v1 = vadd.f32 %v580_v59, %v574_v57  ;;  %v494_v12 = vadd.f32 %v493_v51, %v490_v56  ;;  %v711_v42 = vmul.f32 %v1214_v14, %v710_v26  ;;  %v642_v57 = vstv %s1925_s8  ;;  %s1987_s8 = sld [smem:[#allocation2 + $0x88]] }
  0xdb   : > { %v534_v2 = vadd.f32 %v532_v60, %v526_v58  ;;  %v446_v13 = vadd.f32 %v445_v52, %v442_v45  ;;  %v771_v52 = vmul.f32 %v1667_v63, %v770_v39  ;;  %v690_v45 = vstv %s1923_s7  ;;  %s1983_s7 = sld [smem:[#allocation2 + $0x1e]] }
  0xdc   : > { %v586_v8 = vadd.f32 %v585_v46, %v582_v1  ;;  %v679_v58 = vmul.f32 %v1216_v49, %v678_v43  ;;  %v631_v59 = vmul.f32 %v1216_v49, %v630_v44  ;;  %v774_v60 = vstv %s1929_s9  ;;  %s1989_s9 = sld [smem:[#allocation2 + $0x64]] }
  0xdd   : > { %v538_v11 = vadd.f32 %v537_v47, %v534_v2  ;;  %v500_v15 = vpop.permute.xlu1 %499  ;;  %v694_v14 = vstv %s1943_s19  ;;  %s2003_s19 = sld [smem:[#allocation2 + $0x1f]] }
  0xde   : > { %v452_v16 = vpop.permute.xlu0 %451  ;;  %v502_v0 = vadd.f32 %v500_v15, %v494_v12  ;;  %v590_v29 = vadd.f32 %v589_v5, %v586_v8  ;;  %v691_v5 = vmul.f32 %v1678_v10, %v690_v45  ;;  %v786_v8 = vstv %s1937_s11  ;;  %s1997_s11 = sld [smem:[#allocation2 + $0x66]] }
  0xdf   : > { %v454_v36 = vadd.f32 %v452_v16, %v446_v13  ;;  %v542_v31 = vadd.f32 %v541_v6, %v538_v11  ;;  %v643_v6 = vmul.f32 %v1678_v10, %v642_v57  ;;  %v738_v11 = vstv %s1939_s17  ;;  %s2001_s17 = sld [smem:[#allocation2 + $0x43]] }
  0xe0   : > { %v660_v28 = vadd.f32 %v659_v61, %v502_v0  ;;  %v726_v61 = vstv %s1931_s10  ;;  %v775_v12 = vmul.f32 %v1216_v49, %v774_v60  ;;  %v646_v15 = vstv %s1945_s20  ;;  %s1995_s10 = sld [smem:[#allocation2 + $0x8a]]  ;;  %s2010_s20 = sld [smem:[#allocation2 + $0x45]] }
  0xe1   : > { %v612_v54 = vadd.f32 %v611_v62, %v454_v36  ;;  %v596_v32 = vpop.permute.xlu1 %595  ;;  %v727_v13 = vmul.f32 %v1216_v49, %v726_v61  ;;  %v1218_v36 = vld [vmem:[%s1589_s27 + $0x91] sm:$0xff]  ;;  %v956_v44 = vstv %s1966_s29  ;;  %v816_v49 = vstv %s1974_s6  ;;  %s2026_s29 = sld [smem:[#allocation2 + $0x22]]  ;;  %s2041_s6 = sld [smem:[#allocation2 + $0x8e]] }
  0xe2   : > { %v548_v33 = vpop.permute.xlu0 %547  ;;  %v598_v37 = vadd.f32 %v596_v32, %v590_v29  ;;  %v664_v27 = vadd.f32 %v663_v23, %v660_v28  ;;  %v787_v23 = vmul.f32 %v1678_v10, %v786_v8  ;;  %v860_v28 = vstv %s1952_s24  ;;  %s2012_s24 = sld [smem:[#allocation2 + $0x21]] }
  0xe3   : > { %v550_v38 = vadd.f32 %v548_v33, %v542_v31  ;;  %v616_v48 = vadd.f32 %v615_v24, %v612_v54  ;;  %v739_v24 = vmul.f32 %v1678_v10, %v738_v11  ;;  %v812_v54 = vstv %s1954_s25  ;;  %s2016_s25 = sld [smem:[#allocation2 + $0x8b]] }
  0xe4   : > { %v756_v46 = vadd.f32 %v755_v17, %v598_v37  ;;  %v695_v29 = vmul.f32 %v1218_v36, %v694_v14  ;;  %v647_v31 = vmul.f32 %v1218_v36, %v646_v15  ;;  %v790_v32 = vstv %s1958_s26  ;;  %s2018_s26 = sld [smem:[#allocation2 + $0x67]] }
  0xe5   : > { %v708_v47 = vadd.f32 %v707_v19, %v550_v38  ;;  %v670_v50 = vpop.permute.xlu1 %669  ;;  %v742_v33 = vstv %s1960_s28  ;;  %v861_v41 = vmul.f32 %v1689_v20, %v860_v28  ;;  %v957_v57 = vmul.f32 %v1689_v20, %v956_v44  ;;  %s2024_s28 = sld [smem:[#allocation2 + $0x46]] }
  0xe6   : > { %v622_v51 = vpop.permute.xlu0 %621  ;;  %v672_v55 = vadd.f32 %v670_v50, %v664_v27  ;;  %v760_v1 = vadd.f32 %v759_v9, %v756_v46  ;;  %v813_v9 = vmul.f32 %v1689_v20, %v812_v54  ;;  %v908_v46 = vstv %s1968_s30  ;;  %s2030_s30 = sld [smem:[#allocation2 + $0x8d]] }
  0xe7   : > { %v624_v56 = vadd.f32 %v622_v51, %v616_v48  ;;  %v712_v2 = vadd.f32 %v711_v42, %v708_v47  ;;  %v791_v47 = vmul.f32 %v1218_v36, %v790_v32  ;;  %v743_v27 = vmul.f32 %v1218_v36, %v742_v33 }
  0xe8   : > { %v676_v62 = vadd.f32 %v675_v34, %v672_v55  ;;  %v864_v48 = vstv %s1972_s5  ;;  %v1256_v55 = vld [vmem:[%s1589_s27 + $0xd0] sm:$0xff]  ;;  %v876_v61 = vstv %s1981_s4  ;;  %v972_v14 = vstv %s1995_s10  ;;  %s2032_s5 = sld [smem:[#allocation2 + $0x69]]  ;;  %s2043_s4 = sld [smem:[#allocation2 + $0x6a]] }
  0xe9   : > { %v628_v63 = vadd.f32 %v627_v35, %v624_v56  ;;  %v766_v3 = vpop.permute.xlu1 %765  ;;  %v877_v8 = vmul.f32 %v1700_v30, %v876_v61  ;;  %v924_v15 = vstv %s1997_s11  ;;  %v973_v28 = vmul.f32 %v1700_v30, %v972_v14  ;;  %s2063_s10 = sld [smem:[#allocation5 + $0x2]] }
  0xea   : > { %v718_v4 = vpop.permute.xlu0 %717  ;;  %v768_v7 = vadd.f32 %v766_v3, %v760_v1  ;;  %v680_v19 = vadd.f32 %v679_v58, %v676_v62  ;;  %v909_v58 = vmul.f32 %v1689_v20, %v908_v46  ;;  %v828_v62 = vstv %s1983_s7  ;;  %s2052_s7 = sld [smem:[#allocation5 + $0x1]] }
  0xeb   : > { %v720_v18 = vadd.f32 %v718_v4, %v712_v2  ;;  %v632_v0 = vadd.f32 %v631_v59, %v628_v63  ;;  %v865_v63 = vmul.f32 %v1256_v55, %v864_v48  ;;  %v817_v1 = vmul.f32 %v1256_v55, %v816_v49  ;;  %v1260_v49 = vld [vmem:[%s1589_s27 + $0xd1] sm:$0xff] }
  0xec   : > { %v772_v16 = vadd.f32 %v771_v52, %v768_v7  ;;  %v960_v2 = vstv %s1987_s8  ;;  %v912_v3 = vstv %s1989_s9  ;;  %v829_v11 = vmul.f32 %v1700_v30, %v828_v62  ;;  %s2054_s8 = sld [smem:[#allocation5]]  ;;  %s2061_s9 = sld [smem:[#allocation5 + $0x3]] }
  0xed   : > { %v724_v17 = vadd.f32 %v723_v53, %v720_v18  ;;  %v686_v21 = vpop.permute.xlu1 %685  ;;  %v925_v54 = vmul.f32 %v1700_v30, %v924_v15  ;;  %v892_v32 = vstv %s2010_s20  ;;  %v844_v33 = vstv %s2012_s24  ;;  %s1309_s20 = sshll.u32 %s1522_s16, 9 }
  0xee   : > { %v638_v22 = vpop.permute.xlu0 %637  ;;  %v688_v25 = vadd.f32 %v686_v21, %v680_v19  ;;  %v776_v35 = vadd.f32 %v775_v12, %v772_v16  ;;  %v961_v16 = vmul.f32 %v1256_v55, %v960_v2  ;;  %v880_v19 = vstv %s2001_s17 }
  0xef   : > { %v640_v26 = vadd.f32 %v638_v22, %v632_v0  ;;  %v728_v37 = vadd.f32 %v727_v13, %v724_v17  ;;  %v913_v17 = vmul.f32 %v1256_v55, %v912_v3  ;;  %v832_v0 = vstv %s2003_s19 }
  0xf0   : > { %v692_v34 = vadd.f32 %v691_v5, %v688_v25  ;;  %v845_v44 = vmul.f32 %v1711_v40, %v844_v33  ;;  %v992_v3 = vstv %s2041_s6 }
  0xf1   : > { %v644_v10 = vadd.f32 %v643_v6, %v640_v26  ;;  %v782_v38 = vpop.permute.xlu1 %781 }
  0xf2   : > { %v734_v39 = vpop.permute.xlu0 %733  ;;  %v784_v42 = vadd.f32 %v782_v38, %v776_v35  ;;  %v696_v52 = vadd.f32 %v695_v29, %v692_v34  ;;  %v976_v35 = vstv %s2016_s25 }
  0xf3   : > { %v736_v43 = vadd.f32 %v734_v39, %v728_v37  ;;  %v648_v53 = vadd.f32 %v647_v31, %v644_v10  ;;  %v928_v37 = vstv %s2018_s26  ;;  %s2077_s26 = scalar_lea.hbm %s2129_s3, %s1309_s20 }
  0xf4   : > { %v788_v50 = vadd.f32 %v787_v23, %v784_v42 }
  0xf5   : > { %v740_v51 = vadd.f32 %v739_v24, %v736_v43  ;;  %v702_v56 = vpop.permute.xlu1 %701  ;;  %v1258_v24 = vld [vmem:[%s1589_s27 + $0xf0] sm:$0xff]  ;;  %v893_v43 = vmul.f32 %v1711_v40, %v892_v32  ;;  %s188_s27 = sand.u32 1, %s1465_s13  }
  0xf6   : > { %v654_v45 = vpop.permute.xlu0 %653  ;;  %v704_v59 = vadd.f32 %v702_v56, %v696_v52  ;;  %v792_v5 = vadd.f32 %v791_v47, %v788_v50  ;;  %v881_v34 = vmul.f32 %v1258_v24, %v880_v19  ;;  %v833_v10 = vmul.f32 %v1258_v24, %v832_v0  ;;  %s1129_s11 = sshll.u32 %s188_s27, 5  ;;  %s2085_s16 = scalar_lea.sflag [#allocation3], %s188_s27 }
  0xf7   : > { %v656_v60 = vadd.f32 %v654_v45, %v648_v53  ;;  %v744_v6 = vadd.f32 %v743_v27, %v740_v51  ;;  %v977_v27 = vmul.f32 %v1258_v24, %v976_v35  ;;  %v929_v48 = vmul.f32 %v1258_v24, %v928_v37  ;;  %s190_s17 = scalar_lea.vmem [#allocation7], %s1129_s11 }
  0xf8   : > { %v862_v4 = vadd.f32 %v861_v41, %v704_v59  ;;  %v988_v50 = vstv %s2030_s30  ;;  %v940_v51 = vstv %s2032_s5  ;;  %v896_v52 = vstv %s2024_s28  ;;  %s1037_s19 = sshll.u32 %s190_s17, 4  ;;  %s2079_s19 = int_to_ptr.vmem [resolvable:$true] %s1037_s19 }
  0xf9   : > { %v814_v20 = vadd.f32 %v813_v9, %v656_v60  ;;  %v798_v7 = vpop.permute.xlu1 %797  ;;  %v848_v53 = vstv %s2026_s29  ;;  %v897_v62 = vmul.f32 %v1260_v49, %v896_v52  ;;  %v941_v2 = vmul.f32 %v1711_v40, %v940_v51  ;;  %s1403_s28 = scalar_lea.vmem %s2079_s19, 512  ;;  %s1478_s29 = smov [#allocation7]  }
  0xfa   : > { %v750_v18 = vpop.permute.xlu0 %749  ;;  %v800_v12 = vadd.f32 %v798_v7, %v792_v5  ;;  %v866_v22 = vadd.f32 %v865_v63, %v862_v4  ;;  %v849_v63 = vmul.f32 %v1260_v49, %v848_v53  ;;  %v944_v4 = vstv %s2043_s4  ;;  %p1404_p10 = scmp.ne.s32.totalorder %s2079_s19, %s1403_s28  ;;  %s1407_s30 = sshll.u32 %s1478_s29, 4  ;;  %s1408_s30 = int_to_ptr.vmem [resolvable:$false] %s1407_s30 }
  0xfb   : > { %v752_v13 = vadd.f32 %v750_v18, %v744_v6  ;;  %v818_v23 = vadd.f32 %v817_v1, %v814_v20  ;;  %v989_v1 = vmul.f32 %v1711_v40, %v988_v50  ;;  %v945_v40 = vmul.f32 %v1260_v49, %v944_v4  ;;  %s1409_s5 = scalar_lea.vmem %s1408_s30, 1024  ;;  %p1410_p8 = scmp.lt.s32.totalorder %s2079_s19, %s1408_s30 }
  0xfc   : > { %v958_v36 = vadd.f32 %v957_v57, %v800_v12  ;;  %v1009_v19 = vstv %s2052_s7  ;;  %p1405_p0 = pnand %p1404_p10, %p2142_p12  ;;  %p1411_p11 = scmp.lt.s32.totalorder %s1409_s5, %s1403_s28 }
  0xfd   : > { %v910_v21 = vadd.f32 %v909_v58, %v752_v13  ;;  %v872_v25 = vpop.permute.xlu1 %871  ;;  %v993_v13 = vmul.f32 %v1260_v49, %v992_v3 }
  0xfe   : > { %v824_v26 = vpop.permute.xlu0 %823  ;;  %v874_v29 = vadd.f32 %v872_v25, %v866_v22  ;;  %v962_v30 = vadd.f32 %v961_v16, %v958_v36  ;;  %v1004_v36 = vstv %s2054_s8  ;;  %p1406_p7 = pneg %p1405_p0  ;;  %p1412_p13 = por %p1411_p11, %p1410_p8 }
  0xff   : > { %v826_v31 = vadd.f32 %v824_v26, %v818_v23  ;;  %v914_v41 = vadd.f32 %v913_v17, %v910_v21 }
 0x100   : > { %v878_v38 = vadd.f32 %v877_v8, %v874_v29  ;;  %p1413_p1 = pnand %p1412_p13, %p1406_p7 }
 0x101   : > { %v830_v39 = vadd.f32 %v829_v11, %v826_v31  ;;  %v968_v9 = vpop.permute.xlu1 %967  ;;  %v1014_v31 = vstv %s2063_s10 }
 0x102   : > { %v920_v42 = vpop.permute.xlu0 %919  ;;  %v970_v46 = vadd.f32 %v968_v9, %v962_v30  ;;  %v882_v45 = vadd.f32 %v881_v34, %v878_v38 }
 0x103   : > { %v922_v47 = vadd.f32 %v920_v42, %v914_v41  ;;  %v834_v57 = vadd.f32 %v833_v10, %v830_v39 }
 0x104   : > { %v974_v55 = vadd.f32 %v973_v28, %v970_v46 }
 0x105   : > { %v926_v56 = vadd.f32 %v925_v54, %v922_v47  ;;  %v888_v58 = vpop.permute.xlu1 %887  ;;  %v1019_v54 = vstv %s2061_s9 }
 0x106   : > { %v840_v59 = vpop.permute.xlu0 %839  ;;  %v890_v60 = vadd.f32 %v888_v58, %v882_v45  ;;  %v978_v6 = vadd.f32 %v977_v27, %v974_v55 }
 0x107   : > { %v842_v61 = vadd.f32 %v840_v59, %v834_v57  ;;  %v930_v7 = vadd.f32 %v929_v48, %v926_v56 }
 0x108   : > { %v894_v20 = vadd.f32 %v893_v43, %v890_v60 }
 0x109   : > { %v846_v5 = vadd.f32 %v845_v44, %v842_v61  ;;  %v984_v18 = vpop.permute.xlu1 %983 }
 0x10a   : > { %v936_v8 = vpop.permute.xlu0 %935  ;;  %v986_v11 = vadd.f32 %v984_v18, %v978_v6  ;;  %v898_v16 = vadd.f32 %v897_v62, %v894_v20 }
 0x10b   : > { %v938_v12 = vadd.f32 %v936_v8, %v930_v7  ;;  %v850_v17 = vadd.f32 %v849_v63, %v846_v5 }
 0x10c   : > { %v990_v14 = vadd.f32 %v989_v1, %v986_v11 }
 0x10d   : > { %v942_v15 = vadd.f32 %v941_v2, %v938_v12  ;;  %v904_v0 = vpop.permute.xlu1 %903 }
 0x10e   : > { %v856_v21 = vpop.permute.xlu0 %855  ;;  %v906_v22 = vadd.f32 %v904_v0, %v898_v16  ;;  %v994_v26 = vadd.f32 %v993_v13, %v990_v14 }
 0x10f   : > { %v858_v23 = vadd.f32 %v856_v21, %v850_v17  ;;  %v946_v28 = vadd.f32 %v945_v40, %v942_v15 }
 0x110   : > { %v1010_v24 = vadd.f32 %v1009_v19, %v906_v22 }
 0x111   : > { %v1005_v25 = vadd.f32 %v1004_v36, %v858_v23  ;;  %v1000_v29 = vpop.permute.xlu1 %999 }
 0x112   : > { %v952_v32 = vpop.permute.xlu0 %951  ;;  %1298 = vst.msk [vmem:[%s190_s17 + $0x8] sm:$0xff] %vm1006_vm0, %v1010_v24  ;;  %v1002_v33 = vadd.f32 %v1000_v29, %v994_v26 }
 0x113   : > { %1007 = vst.msk [vmem:[%s190_s17] sm:$0xff] %vm1006_vm0, %v1005_v25  ;;  %v954_v34 = vadd.f32 %v952_v32, %v946_v28 }
 0x114   : > { %v1020_v10 = vadd.f32 %v1019_v54, %v1002_v33 }
 0x115   : > { %v1015_v35 = vadd.f32 %v1014_v31, %v954_v34 }
 0x116   : > { %1302 = vst.msk [vmem:[%s190_s17 + $0x18] sm:$0xff] %vm1006_vm0, %v1020_v10 }
 0x117   : > { %1300 = vst.msk [vmem:[%s190_s17 + $0x10] sm:$0xff] %vm1006_vm0, %v1015_v35 }
 0x118   : > { %1416 = shalt.err (!%p1413_p1)
}
 0x119   : > { %s1417_s6 = scalar_lea.hbm %s2077_s26, 512  ;;  %s1421_s8 = scalar_lea.hbm %s2129_s3, 1024 }
 0x11a   : > { %p1418_p2 = scmp.ne.s32.totalorder %s2077_s26, %s1417_s6  ;;  %p1422_p9 = scmp.lt.u32.totalorder %s2077_s26, %s2129_s3 }
 0x11b   : > { %p1423_p5 = scmp.lt.u32.totalorder %s1421_s8, %s1417_s6  ;;  %p1425_p10 = scmp.lt.u32.totalorder %s1417_s6, %s2077_s26 }
 0x11c   : > { %p1419_p3 = pnand %p1418_p2, %p2142_p12 }
 0x11d   : > { %p1424_p6 = por %p1423_p5, %p1422_p9 }
 0x11e   : > { %p1420_p4 = pneg %p1419_p3 }
 0x11f   : > { %p1426_p0 = por %p1425_p10, %p1424_p6 }
 0x121   : > { %p1427_p7 = pnand %p1426_p0, %p1420_p4 }
 0x123   : > { %1430 = shalt.err (!%p1427_p7)
}
 0x124   : > { %s1479_s10 = smov 128   ;;  %s1480_s11 = smov 8  }
 0x125   : > { %1318 = dma.vmem_to_hbm [thread:$0]  (%p2142_p12), %s2079_s19, 512, %s2077_s26, %s2085_s16, %s1479_s10, %s1479_s10, %s1480_s11  }
 0x126 PF: > { %p1335_p8 = scmp.ge.s32.totalorder %s1473_s15, 2  ;;  %s1052_s17 = sand.u32 1, %s1461_s12  }
 0x127   : > { %p2143_p11 = scmp.ne.s32.totalorder %s2134_s23, 0  ;;  %s1053_s20 = scalar_lea.sflag [#allocation3], %s1052_s17 }
 0x129   : > { %p1328_p13 = pnand %p1335_p8, %p2143_p11 }
 0x12b   : > { %1456 = dma.done.wait (!%p1328_p13), %s1053_s20, 512  }
 0x12c   : > { %1458 = vsyncadd (!%p1328_p13), %s1053_s20, 4294966784  ;;  %p15_p1 = scmp.ge.s32.totalorder %s1526_s18, 4   ;;  %s2144_s12 = smov %s1465_s13 }
 0x12d   : > { %s2145_s13 = smov %s1469_s14  ;;  %s2146_s14 = smov %s1537_s21 }
 0x12e   : > { %s2147_s15 = smov %s1526_s18  ;;  %17 = sbr.rel (!%p15_p1) target bundleno = 5 (0x5), region = 94 }
 0x135   :  { %1058 = vsyncpa [#allocation3], 1 }
 0x136   :  { %1060 = vsyncpa [#allocation3 + $0x1], 1 }
 0x137   :  { %1061 = vsyncpa [#allocation4], 1 }
 0x138   :  { %1063 = vsyncpa [#allocation4 + $0x1], 1 }
 0x139   :  { %1064 = vsyncpa [#allocation6], 1 }

</bundles_post_ra>
